<compile_context>
chip_gen: v6e
topology: v6e:2x2x1
jax: 0.10.0
libtpu: 0.0.40
codegen_flags: <defaults>
</compile_context>

<pallas_src>
import functools
import jax
import jax.numpy as jnp
from jax.experimental import pallas as pl
from jax.experimental.pallas import tpu as pltpu


# ---------------------------------------------------------------------------
# elementwise helpers (usable both inside kernels and in the jnp reference)
# ---------------------------------------------------------------------------
def _gelu(x):
    # TODO(synk): nn.GELU default uses the exact erf form; tanh approximation used here
    # since erf lowering in Mosaic is not guaranteed (reference uses the same formula).
    c = 0.7978845608028654  # sqrt(2/pi)
    return 0.5 * x * (1.0 + jnp.tanh(c * (x + 0.044715 * x * x * x)))


def _layernorm(x, g, b, eps):
    mu = jnp.mean(x, axis=-1, keepdims=True)
    var = jnp.mean((x - mu) ** 2, axis=-1, keepdims=True)
    return (x - mu) * jax.lax.rsqrt(var + eps) * g + b


# ---------------------------------------------------------------------------
# Fused all-blocks kernel: grid = (batch, depth); activations live in VMEM
# across the whole depth loop (output block is the carried state).
# ---------------------------------------------------------------------------
def _blocks_kernel(x_ref, n1g_ref, n1b_ref, wqkv_ref, bqkv_ref, wproj_ref, bproj_ref,
                   n2g_ref, n2b_ref, fc1w_ref, fc1b_ref, fc2w_ref, fc2b_ref,
                   o_ref, *, num_heads, scale, eps):
    # layer 0: seed the VMEM-resident activation block from the HBM input
    @pl.when(pl.program_id(1) == 0)
    def _():
        o_ref[...] = x_ref[...]

    x = o_ref[0]                                                     # (N, E), VMEM-resident carry

    # --- attention branch: x + proj(attn(norm1(x))) ---
    h = _layernorm(x, n1g_ref[0], n1b_ref[0], eps)
    acc = jnp.zeros(x.shape, jnp.float32)
    for hh in range(num_heads):                                      # small, unrolled
        # scale folded into q (N x d) instead of the (N x N) score matrix
        q = (jnp.dot(h, wqkv_ref[0, hh], preferred_element_type=jnp.float32)
             + bqkv_ref[0, hh]) * scale
        k = (jnp.dot(h, wqkv_ref[0, num_heads + hh], preferred_element_type=jnp.float32)
             + bqkv_ref[0, num_heads + hh])
        v = (jnp.dot(h, wqkv_ref[0, 2 * num_heads + hh], preferred_element_type=jnp.float32)
             + bqkv_ref[0, 2 * num_heads + hh])
        s = jax.lax.dot_general(q, k, (((1,), (1,)), ((), ())),
                                preferred_element_type=jnp.float32)   # (N, N)
        m = jnp.max(s, axis=-1, keepdims=True)
        p = jnp.exp(s - m)
        p = p * pl.reciprocal(jnp.sum(p, axis=-1, keepdims=True), approx=True)
        a = jnp.dot(p, v, preferred_element_type=jnp.float32)         # (N, d)
        # per-head row-slice of the projection weight, accumulated -> no concat/relayout
        acc = acc + jnp.dot(a, wproj_ref[0, hh], preferred_element_type=jnp.float32)
    x = x + acc + bproj_ref[0]                                        # residual fused in-kernel

    # --- MLP branch: x + fc2(gelu(fc1(norm2(x)))) ---
    h2 = _layernorm(x, n2g_ref[0], n2b_ref[0], eps)
    h2 = _gelu(jnp.dot(h2, fc1w_ref[0], preferred_element_type=jnp.float32) + fc1b_ref[0])
    h2 = jnp.dot(h2, fc2w_ref[0], preferred_element_type=jnp.float32) + fc2b_ref[0]
    o_ref[0] = (x + h2).astype(o_ref.dtype)                           # carry to next layer


def fused_blocks(x, blocks, *, num_heads, scale, eps=1e-6):
    B, N, E = x.shape
    d = E // num_heads
    depth = len(blocks)
    hidden = blocks[0]["fc1_w"].shape[1]
    H3 = 3 * num_heads

    # One-time weight repack: head split lives on the weights (leading dim), not on the
    # activations, so no qkv 5-D transpose materializes in HBM between kernels.  All
    # layers are stacked along a leading depth axis and streamed per grid step.
    def repack_qkv_w(w):
        w = w.reshape(E, 3, num_heads, d).transpose(1, 2, 0, 3)
        return w.reshape(H3, E, d)                                    # [q_0..q_{H-1}, k_0.., v_0..]

    wqkv = jnp.stack([repack_qkv_w(p["qkv_w"]) for p in blocks])      # (L, 3H, E, d)
    bqkv = jnp.stack([p["qkv_b"].reshape(H3, 1, d) for p in blocks])  # (L, 3H, 1, d)
    wproj = jnp.stack([p["proj_w"].reshape(num_heads, d, E) for p in blocks])  # (L, H, d, E)
    bproj = jnp.stack([p["proj_b"].reshape(1, E) for p in blocks])
    n1g = jnp.stack([p["n1_g"].reshape(1, E) for p in blocks])
    n1b = jnp.stack([p["n1_b"].reshape(1, E) for p in blocks])
    n2g = jnp.stack([p["n2_g"].reshape(1, E) for p in blocks])
    n2b = jnp.stack([p["n2_b"].reshape(1, E) for p in blocks])
    fc1w = jnp.stack([p["fc1_w"] for p in blocks])                    # (L, E, hidden)
    fc1b = jnp.stack([p["fc1_b"].reshape(1, hidden) for p in blocks])
    fc2w = jnp.stack([p["fc2_w"] for p in blocks])                    # (L, hidden, E)
    fc2b = jnp.stack([p["fc2_b"].reshape(1, E) for p in blocks])

    kernel = functools.partial(_blocks_kernel, num_heads=num_heads, scale=scale, eps=eps)
    lay3 = lambda b, l: (l, 0, 0)
    lay4 = lambda b, l: (l, 0, 0, 0)
    return pl.pallas_call(
        kernel,
        out_shape=jax.ShapeDtypeStruct((B, N, E), jnp.float32),
        grid=(B, depth),
        in_specs=[
            pl.BlockSpec((1, N, E), lambda b, l: (b, 0, 0)),          # x (per-batch block)
            pl.BlockSpec((1, 1, E), lay3),                            # norm1 gamma
            pl.BlockSpec((1, 1, E), lay3),                            # norm1 beta
            pl.BlockSpec((1, H3, E, d), lay4),                        # qkv weight (head-major)
            pl.BlockSpec((1, H3, 1, d), lay4),                        # qkv bias
            pl.BlockSpec((1, num_heads, d, E), lay4),                 # proj weight (head-major rows)
            pl.BlockSpec((1, 1, E), lay3),                            # proj bias
            pl.BlockSpec((1, 1, E), lay3),                            # norm2 gamma
            pl.BlockSpec((1, 1, E), lay3),                            # norm2 beta
            pl.BlockSpec((1, E, hidden), lay3),                       # fc1 weight
            pl.BlockSpec((1, 1, hidden), lay3),                       # fc1 bias
            pl.BlockSpec((1, hidden, E), lay3),                       # fc2 weight
            pl.BlockSpec((1, 1, E), lay3),                            # fc2 bias
        ],
        # same block index across the depth axis -> activation stays VMEM-resident
        out_specs=pl.BlockSpec((1, N, E), lambda b, l: (b, 0, 0)),
        compiler_params=pltpu.CompilerParams(
            dimension_semantics=("parallel", "arbitrary")),           # batch across TCs, depth sequential
    )(x, n1g, n1b, wqkv, bqkv, wproj, bproj, n2g, n2b, fc1w, fc1b, fc2w, fc2b)


# ---------------------------------------------------------------------------
# Fused final LayerNorm + classification head (cls tokens only)
# ---------------------------------------------------------------------------
def _final_kernel(x_ref, g_ref, b_ref, w_ref, hb_ref, o_ref, *, eps):
    h = _layernorm(x_ref[...], g_ref[...], b_ref[...], eps)
    o_ref[...] = (jnp.dot(h, w_ref[...], preferred_element_type=jnp.float32)
                  + hb_ref[...]).astype(o_ref.dtype)


def final_norm_head(cls_tokens, g, b, head_w, head_b, eps=1e-6):
    B, E = cls_tokens.shape
    NC = head_w.shape[1]
    kernel = functools.partial(_final_kernel, eps=eps)
    return pl.pallas_call(
        kernel,
        out_shape=jax.ShapeDtypeStruct((B, NC), jnp.float32),
        grid=(1,),
        in_specs=[
            pl.BlockSpec((B, E), lambda i: (0, 0)),
            pl.BlockSpec((1, E), lambda i: (0, 0)),
            pl.BlockSpec((1, E), lambda i: (0, 0)),
            pl.BlockSpec((E, NC), lambda i: (0, 0)),
            pl.BlockSpec((1, NC), lambda i: (0, 0)),
        ],
        out_specs=pl.BlockSpec((B, NC), lambda i: (0, 0)),
    )(cls_tokens, g.reshape(1, E), b.reshape(1, E), head_w, head_b.reshape(1, NC))


# ---------------------------------------------------------------------------
# Model (forward_features + head) built from the fused Pallas kernels
# ---------------------------------------------------------------------------
def model_forward(x, y, params, cfg):
    num_heads = cfg["num_heads"]
    ph, pw = cfg["patch_size"]

    out = jnp.concatenate([x, y], axis=2)            # (B, C, H, W) NCHW; cat along H
    B, C, H, W = out.shape
    num_patches = (H // ph) * (W // pw)
    out = out.reshape(B, num_patches, -1)            # PatchEmbed: pure reshape
    E = out.shape[-1]

    cls = jnp.broadcast_to(params["cls_token"], (B, 1, E))
    out = jnp.concatenate([cls, out], axis=1)        # (B, N, E)
    head_dim = E // num_heads
    scale = head_dim ** -0.5
    # need_pos_embed defaults to False -> no positional encoding; dropouts / drop-path are
    # eval no-ops; LayerNorm eps=1e-6 matches the module's norm_layer=partial(LayerNorm,1e-6).

    out = fused_blocks(out, params["blocks"], num_heads=num_heads, scale=scale, eps=1e-6)

    # LayerNorm is per-token, so norm(out)[:, 0] == norm(out[:, 0]): fuse norm + head on cls.
    return final_norm_head(out[:, 0], params["norm_g"], params["norm_b"],
                           params["head_w"], params["head_b"], eps=1e-6)


# ---------------------------------------------------------------------------
# Pure-jnp reference (independent implementation for the correctness check)
# ---------------------------------------------------------------------------
def ref_forward(x, y, params, cfg):
    num_heads = cfg["num_heads"]
    ph, pw = cfg["patch_size"]

    def ln(a, g, b):
        mu = a.mean(-1, keepdims=True)
        var = ((a - mu) ** 2).mean(-1, keepdims=True)
        return (a - mu) / jnp.sqrt(var + 1e-6) * g + b

    out = jnp.concatenate([x, y], axis=2)
    B, C, H, W = out.shape
    num_patches = (H // ph) * (W // pw)
    out = out.reshape(B, num_patches, -1)
    E = out.shape[-1]
    out = jnp.concatenate([jnp.broadcast_to(params["cls_token"], (B, 1, E)), out], axis=1)
    N = out.shape[1]
    head_dim = E // num_heads
    scale = head_dim ** -0.5

    for p in params["blocks"]:
        h = ln(out, p["n1_g"], p["n1_b"])
        qkv = h @ p["qkv_w"] + p["qkv_b"]
        qkv = qkv.reshape(B, N, 3, num_heads, head_dim).transpose(2, 0, 3, 1, 4)
        q, k, v = qkv[0], qkv[1], qkv[2]
        s = jnp.einsum("bhnd,bhmd->bhnm", q, k) * scale
        a = jax.nn.softmax(s, axis=-1)
        av = jnp.einsum("bhnm,bhmd->bhnd", a, v).transpose(0, 2, 1, 3).reshape(B, N, E)
        out = out + (av @ p["proj_w"] + p["proj_b"])

        h = ln(out, p["n2_g"], p["n2_b"])
        h = _gelu(h @ p["fc1_w"] + p["fc1_b"])
        out = out + (h @ p["fc2_w"] + p["fc2_b"])

    out = ln(out, params["norm_g"], params["norm_b"])
    return out[:, 0] @ params["head_w"] + params["head_b"]


# ---------------------------------------------------------------------------
# Deterministic synthetic parameters (shapes follow the module's __init__)
# ---------------------------------------------------------------------------
def init_params(key, embed_dim, depth, mlp_ratio, num_classes):
    hidden = int(embed_dim * mlp_ratio)
    keys = iter(jax.random.split(key, depth * 4 + 2))

    def lin(k, fan_in, fan_out, std=0.01):
        w = jax.random.normal(k, (fan_in, fan_out), jnp.float32) * std
        return w, jnp.zeros((fan_out,), jnp.float32)

    blocks = []
    for _ in range(depth):
        qkv_w, qkv_b = lin(next(keys), embed_dim, 3 * embed_dim)
        proj_w, proj_b = lin(next(keys), embed_dim, embed_dim)
        fc1_w, fc1_b = lin(next(keys), embed_dim, hidden)
        fc2_w, fc2_b = lin(next(keys), hidden, embed_dim)
        blocks.append(dict(
            n1_g=jnp.ones((embed_dim,), jnp.float32), n1_b=jnp.zeros((embed_dim,), jnp.float32),
            n2_g=jnp.ones((embed_dim,), jnp.float32), n2_b=jnp.zeros((embed_dim,), jnp.float32),
            qkv_w=qkv_w, qkv_b=qkv_b, proj_w=proj_w, proj_b=proj_b,
            fc1_w=fc1_w, fc1_b=fc1_b, fc2_w=fc2_w, fc2_b=fc2_b))
    head_w, head_b = lin(next(keys), embed_dim, num_classes)
    cls_token = jax.random.normal(next(keys), (1, 1, embed_dim), jnp.float32) * 0.02
    return dict(blocks=blocks,
                norm_g=jnp.ones((embed_dim,), jnp.float32),
                norm_b=jnp.zeros((embed_dim,), jnp.float32),
                head_w=head_w, head_b=head_b, cls_token=cls_token)


if __name__ == "__main__":
    # Small, self-consistent configuration:
    #   img_size=(16,16), patch=(8,8), in_c=1 -> num_patches=4,
    #   embed_dim = in_c*16*16/4 = 64 (PatchEmbed is a pure reshape).
    cfg = dict(patch_size=(8, 8), num_heads=4)
    B, in_c = 2, 1
    embed_dim, depth, num_classes, mlp_ratio = 64, 2, 10, 4.0

    key = jax.random.PRNGKey(0)
    kx, ky, kp = jax.random.split(key, 3)
    # x and y are concatenated along H (dim=2) to form the 16x16 fused image.
    x = jax.random.normal(kx, (B, in_c, 8, 16), jnp.float32)
    y = jax.random.normal(ky, (B, in_c, 8, 16), jnp.float32)
    params = init_params(kp, embed_dim, depth, mlp_ratio, num_classes)

    fwd = jax.jit(lambda xx, yy, pp: model_forward(xx, yy, pp, cfg))
    out = jax.block_until_ready(fwd(x, y, params))

    ref = ref_forward(x, y, params, cfg)
    assert out.shape == (B, num_classes)
    assert jnp.allclose(out, ref, atol=2e-4, rtol=2e-4), (out, ref)
    print("KERNEL_OK")
</pallas_src>

<mosaic_0001>
module attributes {stable_mosaic.version = 11 : i64} {
  func.func @_final_kernel(%arg0: i32, %arg1: memref<2x64xf32, #tpu.memory_space<vmem>>, %arg2: memref<1x64xf32, #tpu.memory_space<vmem>>, %arg3: memref<1x64xf32, #tpu.memory_space<vmem>>, %arg4: memref<64x10xf32, #tpu.memory_space<vmem>>, %arg5: memref<1x10xf32, #tpu.memory_space<vmem>>, %arg6: memref<2x10xf32, #tpu.memory_space<vmem>>) attributes {dimension_semantics = [#tpu.dimension_semantics<arbitrary>], iteration_bounds = array<i64: 1>, scalar_prefetch = 0 : i64, scratch_operands = 0 : i64, tpu.core_type = #tpu.core_type<tc>, window_params = [{pipeline_mode = #tpu.pipeline_mode<synchronous>, transform_indices = @transform_0, window_bounds = array<i64: 2, 64>}, {pipeline_mode = #tpu.pipeline_mode<synchronous>, transform_indices = @transform_1, window_bounds = array<i64: 1, 64>}, {pipeline_mode = #tpu.pipeline_mode<synchronous>, transform_indices = @transform_2, window_bounds = array<i64: 1, 64>}, {pipeline_mode = #tpu.pipeline_mode<synchronous>, transform_indices = @transform_3, window_bounds = array<i64: 64, 10>}, {pipeline_mode = #tpu.pipeline_mode<synchronous>, transform_indices = @transform_4, window_bounds = array<i64: 1, 10>}, {pipeline_mode = #tpu.pipeline_mode<synchronous>, transform_indices = @transform_5, window_bounds = array<i64: 2, 10>}]} {
    %c0 = arith.constant 0 : index
    %c0_0 = arith.constant 0 : index
    %0 = vector.load %arg1[%c0, %c0_0] : memref<2x64xf32, #tpu.memory_space<vmem>>, vector<2x64xf32>
    %c0_1 = arith.constant 0 : index
    %c0_2 = arith.constant 0 : index
    %1 = vector.load %arg2[%c0_1, %c0_2] : memref<1x64xf32, #tpu.memory_space<vmem>>, vector<1x64xf32>
    %c0_3 = arith.constant 0 : index
    %c0_4 = arith.constant 0 : index
    %2 = vector.load %arg3[%c0_3, %c0_4] : memref<1x64xf32, #tpu.memory_space<vmem>>, vector<1x64xf32>
    %cst = arith.constant dense<0.000000e+00> : vector<2xf32>
    %3 = vector.multi_reduction <add>, %0, %cst [1] : vector<2x64xf32> to vector<2xf32>
    %4 = vector.shape_cast %3 : vector<2xf32> to vector<2x1xf32>
    %cst_5 = arith.constant 6.400000e+01 : f32
    %5 = vector.broadcast %cst_5 : f32 to vector<2x1xf32>
    %6 = arith.divf %4, %5 : vector<2x1xf32>
    %7 = vector.broadcast %6 : vector<2x1xf32> to vector<2x64xf32>
    %8 = arith.subf %0, %7 : vector<2x64xf32>
    %9 = arith.mulf %8, %8 : vector<2x64xf32>
    %cst_6 = arith.constant dense<0.000000e+00> : vector<2xf32>
    %10 = vector.multi_reduction <add>, %9, %cst_6 [1] : vector<2x64xf32> to vector<2xf32>
    %11 = vector.shape_cast %10 : vector<2xf32> to vector<2x1xf32>
    %cst_7 = arith.constant 6.400000e+01 : f32
    %12 = vector.broadcast %cst_7 : f32 to vector<2x1xf32>
    %13 = arith.divf %11, %12 : vector<2x1xf32>
    %14 = vector.broadcast %6 : vector<2x1xf32> to vector<2x64xf32>
    %15 = arith.subf %0, %14 : vector<2x64xf32>
    %cst_8 = arith.constant 9.99999997E-7 : f32
    %16 = vector.broadcast %cst_8 : f32 to vector<2x1xf32>
    %17 = arith.addf %13, %16 : vector<2x1xf32>
    %18 = math.rsqrt %17 : vector<2x1xf32>
    %19 = vector.broadcast %18 : vector<2x1xf32> to vector<2x64xf32>
    %20 = arith.mulf %15, %19 : vector<2x64xf32>
    %21 = vector.broadcast %1 : vector<1x64xf32> to vector<2x64xf32>
    %22 = arith.mulf %20, %21 : vector<2x64xf32>
    %23 = vector.broadcast %2 : vector<1x64xf32> to vector<2x64xf32>
    %24 = arith.addf %22, %23 : vector<2x64xf32>
    %c0_9 = arith.constant 0 : index
    %c0_10 = arith.constant 0 : index
    %25 = vector.load %arg4[%c0_9, %c0_10] : memref<64x10xf32, #tpu.memory_space<vmem>>, vector<64x10xf32>
    %cst_11 = arith.constant dense<0.000000e+00> : vector<2x10xf32>
    %26 = tpu.matmul %24, %25, %cst_11 {dimension_numbers = #tpu.dot_dimension_numbers<[1], [0], [0], [1], [0, 0, 1, 1], [], []>} : vector<2x64xf32>, vector<64x10xf32>, vector<2x10xf32> -> vector<2x10xf32>
    %c0_12 = arith.constant 0 : index
    %c0_13 = arith.constant 0 : index
    %27 = vector.load %arg5[%c0_12, %c0_13] : memref<1x10xf32, #tpu.memory_space<vmem>>, vector<1x10xf32>
    %28 = vector.broadcast %27 : vector<1x10xf32> to vector<2x10xf32>
    %29 = arith.addf %26, %28 : vector<2x10xf32>
    %c0_14 = arith.constant 0 : index
    %c0_15 = arith.constant 0 : index
    %30 = vector.load %arg6[%c0_14, %c0_15] : memref<2x10xf32, #tpu.memory_space<vmem>>, vector<2x10xf32>
    tpu.vector_store %arg6[%c0_14, %c0_15], %29 {strides = array<i32>} : memref<2x10xf32, #tpu.memory_space<vmem>>, vector<2x10xf32>,
    return
  }
  func.func @transform_0(%arg0: i32) -> (i32, i32) {
    %c0_i32 = arith.constant 0 : i32
    %c0_i32_0 = arith.constant 0 : i32
    %c0_i32_1 = arith.constant 0 : i32
    return %c0_i32, %c0_i32_0 : i32, i32
  }
  func.func @transform_1(%arg0: i32) -> (i32, i32) {
    %c0_i32 = arith.constant 0 : i32
    %c0_i32_0 = arith.constant 0 : i32
    %c0_i32_1 = arith.constant 0 : i32
    return %c0_i32, %c0_i32_0 : i32, i32
  }
  func.func @transform_2(%arg0: i32) -> (i32, i32) {
    %c0_i32 = arith.constant 0 : i32
    %c0_i32_0 = arith.constant 0 : i32
    %c0_i32_1 = arith.constant 0 : i32
    return %c0_i32, %c0_i32_0 : i32, i32
  }
  func.func @transform_3(%arg0: i32) -> (i32, i32) {
    %c0_i32 = arith.constant 0 : i32
    %c0_i32_0 = arith.constant 0 : i32
    %c0_i32_1 = arith.constant 0 : i32
    return %c0_i32, %c0_i32_0 : i32, i32
  }
  func.func @transform_4(%arg0: i32) -> (i32, i32) {
    %c0_i32 = arith.constant 0 : i32
    %c0_i32_0 = arith.constant 0 : i32
    %c0_i32_1 = arith.constant 0 : i32
    return %c0_i32, %c0_i32_0 : i32, i32
  }
  func.func @transform_5(%arg0: i32) -> (i32, i32) {
    %c0_i32 = arith.constant 0 : i32
    %c0_i32_0 = arith.constant 0 : i32
    %c0_i32_1 = arith.constant 0 : i32
    return %c0_i32, %c0_i32_0 : i32, i32
  }
}

module attributes {stable_mosaic.version = 11 : i64} {
  func.func @_blocks_kernel(%arg0: i32, %arg1: i32, %arg2: memref<1x5x64xf32, #tpu.memory_space<vmem>>, %arg3: memref<1x1x64xf32, #tpu.memory_space<vmem>>, %arg4: memref<1x1x64xf32, #tpu.memory_space<vmem>>, %arg5: memref<1x12x64x16xf32, #tpu.memory_space<vmem>>, %arg6: memref<1x12x1x16xf32, #tpu.memory_space<vmem>>, %arg7: memref<1x4x16x64xf32, #tpu.memory_space<vmem>>, %arg8: memref<1x1x64xf32, #tpu.memory_space<vmem>>, %arg9: memref<1x1x64xf32, #tpu.memory_space<vmem>>, %arg10: memref<1x1x64xf32, #tpu.memory_space<vmem>>, %arg11: memref<1x64x256xf32, #tpu.memory_space<vmem>>, %arg12: memref<1x1x256xf32, #tpu.memory_space<vmem>>, %arg13: memref<1x256x64xf32, #tpu.memory_space<vmem>>, %arg14: memref<1x1x64xf32, #tpu.memory_space<vmem>>, %arg15: memref<1x5x64xf32, #tpu.memory_space<vmem>>) attributes {dimension_semantics = [#tpu.dimension_semantics<parallel>, #tpu.dimension_semantics<arbitrary>], iteration_bounds = array<i64: 2, 2>, scalar_prefetch = 0 : i64, scratch_operands = 0 : i64, tpu.core_type = #tpu.core_type<tc>, window_params = [{transform_indices = @transform_0, window_bounds = array<i64: 1, 5, 64>}, {transform_indices = @transform_1, window_bounds = array<i64: 1, 1, 64>}, {transform_indices = @transform_2, window_bounds = array<i64: 1, 1, 64>}, {transform_indices = @transform_3, window_bounds = array<i64: 1, 12, 64, 16>}, {transform_indices = @transform_4, window_bounds = array<i64: 1, 12, 1, 16>}, {transform_indices = @transform_5, window_bounds = array<i64: 1, 4, 16, 64>}, {transform_indices = @transform_6, window_bounds = array<i64: 1, 1, 64>}, {transform_indices = @transform_7, window_bounds = array<i64: 1, 1, 64>}, {transform_indices = @transform_8, window_bounds = array<i64: 1, 1, 64>}, {transform_indices = @transform_9, window_bounds = array<i64: 1, 64, 256>}, {transform_indices = @transform_10, window_bounds = array<i64: 1, 1, 256>}, {transform_indices = @transform_11, window_bounds = array<i64: 1, 256, 64>}, {transform_indices = @transform_12, window_bounds = array<i64: 1, 1, 64>}, {transform_indices = @transform_13, window_bounds = array<i64: 1, 5, 64>}]} {
    %c0_i32 = arith.constant 0 : i32
    %0 = arith.cmpi eq, %arg1, %c0_i32 : i32
    %1 = arith.extui %0 : i1 to i32
    %c0_i32_0 = arith.constant 0 : i32
    %2 = arith.cmpi ne, %1, %c0_i32_0 : i32
    scf.if %2 {
      %c0_186 = arith.constant 0 : index
      %c0_187 = arith.constant 0 : index
      %c0_188 = arith.constant 0 : index
      %250 = vector.load %arg2[%c0_186, %c0_187, %c0_188] : memref<1x5x64xf32, #tpu.memory_space<vmem>>, vector<1x5x64xf32>
      %c0_189 = arith.constant 0 : index
      %c0_190 = arith.constant 0 : index
      %c0_191 = arith.constant 0 : index
      %251 = vector.load %arg15[%c0_189, %c0_190, %c0_191] : memref<1x5x64xf32, #tpu.memory_space<vmem>>, vector<1x5x64xf32>
      tpu.vector_store %arg15[%c0_189, %c0_190, %c0_191], %250 {strides = array<i32>} : memref<1x5x64xf32, #tpu.memory_space<vmem>>, vector<1x5x64xf32>,
    } else {
    }
    %c0 = arith.constant 0 : index
    %c0_1 = arith.constant 0 : index
    %c0_2 = arith.constant 0 : index
    %3 = vector.load %arg15[%c0, %c0_1, %c0_2] : memref<1x5x64xf32, #tpu.memory_space<vmem>>, vector<1x5x64xf32>
    %4 = vector.shape_cast %3 : vector<1x5x64xf32> to vector<5x64xf32>
    %c0_3 = arith.constant 0 : index
    %c0_4 = arith.constant 0 : index
    %c0_5 = arith.constant 0 : index
    %5 = vector.load %arg3[%c0_3, %c0_4, %c0_5] : memref<1x1x64xf32, #tpu.memory_space<vmem>>, vector<1x1x64xf32>
    %6 = vector.shape_cast %5 : vector<1x1x64xf32> to vector<1x64xf32>
    %c0_6 = arith.constant 0 : index
    %c0_7 = arith.constant 0 : index
    %c0_8 = arith.constant 0 : index
    %7 = vector.load %arg4[%c0_6, %c0_7, %c0_8] : memref<1x1x64xf32, #tpu.memory_space<vmem>>, vector<1x1x64xf32>
    %8 = vector.shape_cast %7 : vector<1x1x64xf32> to vector<1x64xf32>
    %cst = arith.constant dense<0.000000e+00> : vector<5xf32>
    %9 = vector.multi_reduction <add>, %4, %cst [1] : vector<5x64xf32> to vector<5xf32>
    %10 = vector.shape_cast %9 : vector<5xf32> to vector<5x1xf32>
    %cst_9 = arith.constant 6.400000e+01 : f32
    %11 = vector.broadcast %cst_9 : f32 to vector<5x1xf32>
    %12 = arith.divf %10, %11 : vector<5x1xf32>
    %13 = vector.broadcast %12 : vector<5x1xf32> to vector<5x64xf32>
    %14 = arith.subf %4, %13 : vector<5x64xf32>
    %15 = arith.mulf %14, %14 : vector<5x64xf32>
    %cst_10 = arith.constant dense<0.000000e+00> : vector<5xf32>
    %16 = vector.multi_reduction <add>, %15, %cst_10 [1] : vector<5x64xf32> to vector<5xf32>
    %17 = vector.shape_cast %16 : vector<5xf32> to vector<5x1xf32>
    %cst_11 = arith.constant 6.400000e+01 : f32
    %18 = vector.broadcast %cst_11 : f32 to vector<5x1xf32>
    %19 = arith.divf %17, %18 : vector<5x1xf32>
    %20 = vector.broadcast %12 : vector<5x1xf32> to vector<5x64xf32>
    %21 = arith.subf %4, %20 : vector<5x64xf32>
    %cst_12 = arith.constant 9.99999997E-7 : f32
    %22 = vector.broadcast %cst_12 : f32 to vector<5x1xf32>
    %23 = arith.addf %19, %22 : vector<5x1xf32>
    %24 = math.rsqrt %23 : vector<5x1xf32>
    %25 = vector.broadcast %24 : vector<5x1xf32> to vector<5x64xf32>
    %26 = arith.mulf %21, %25 : vector<5x64xf32>
    %27 = vector.broadcast %6 : vector<1x64xf32> to vector<5x64xf32>
    %28 = arith.mulf %26, %27 : vector<5x64xf32>
    %29 = vector.broadcast %8 : vector<1x64xf32> to vector<5x64xf32>
    %30 = arith.addf %28, %29 : vector<5x64xf32>
    %cst_13 = arith.constant 0.000000e+00 : f32
    %31 = vector.broadcast %cst_13 : f32 to vector<5x64xf32>
    %c0_14 = arith.constant 0 : index
    %c0_15 = arith.constant 0 : index
    %c0_16 = arith.constant 0 : index
    %c0_17 = arith.constant 0 : index
    %32 = vector.load %arg5[%c0_14, %c0_15, %c0_16, %c0_17] : memref<1x12x64x16xf32, #tpu.memory_space<vmem>>, vector<1x1x64x16xf32>
    %33 = vector.shape_cast %32 : vector<1x1x64x16xf32> to vector<64x16xf32>
    %cst_18 = arith.constant dense<0.000000e+00> : vector<5x16xf32>
    %34 = tpu.matmul %30, %33, %cst_18 {dimension_numbers = #tpu.dot_dimension_numbers<[1], [0], [0], [1], [0, 0, 1, 1], [], []>} : vector<5x64xf32>, vector<64x16xf32>, vector<5x16xf32> -> vector<5x16xf32>
    %c0_19 = arith.constant 0 : index
    %c0_20 = arith.constant 0 : index
    %c0_21 = arith.constant 0 : index
    %c0_22 = arith.constant 0 : index
    %35 = vector.load %arg6[%c0_19, %c0_20, %c0_21, %c0_22] : memref<1x12x1x16xf32, #tpu.memory_space<vmem>>, vector<1x1x1x16xf32>
    %36 = vector.shape_cast %35 : vector<1x1x1x16xf32> to vector<1x16xf32>
    %37 = vector.broadcast %36 : vector<1x16xf32> to vector<5x16xf32>
    %38 = arith.addf %34, %37 : vector<5x16xf32>
    %cst_23 = arith.constant 2.500000e-01 : f32
    %39 = vector.broadcast %cst_23 : f32 to vector<5x16xf32>
    %40 = arith.mulf %38, %39 : vector<5x16xf32>
    %c0_24 = arith.constant 0 : index
    %c4 = arith.constant 4 : index
    %c0_25 = arith.constant 0 : index
    %c0_26 = arith.constant 0 : index
    %41 = vector.load %arg5[%c0_24, %c4, %c0_25, %c0_26] : memref<1x12x64x16xf32, #tpu.memory_space<vmem>>, vector<1x1x64x16xf32>
    %42 = vector.shape_cast %41 : vector<1x1x64x16xf32> to vector<64x16xf32>
    %cst_27 = arith.constant dense<0.000000e+00> : vector<5x16xf32>
    %43 = tpu.matmul %30, %42, %cst_27 {dimension_numbers = #tpu.dot_dimension_numbers<[1], [0], [0], [1], [0, 0, 1, 1], [], []>} : vector<5x64xf32>, vector<64x16xf32>, vector<5x16xf32> -> vector<5x16xf32>
    %c0_28 = arith.constant 0 : index
    %c4_29 = arith.constant 4 : index
    %c0_30 = arith.constant 0 : index
    %c0_31 = arith.constant 0 : index
    %44 = vector.load %arg6[%c0_28, %c4_29, %c0_30, %c0_31] : memref<1x12x1x16xf32, #tpu.memory_space<vmem>>, vector<1x1x1x16xf32>
    %45 = vector.shape_cast %44 : vector<1x1x1x16xf32> to vector<1x16xf32>
    %46 = vector.broadcast %45 : vector<1x16xf32> to vector<5x16xf32>
    %47 = arith.addf %43, %46 : vector<5x16xf32>
    %c0_32 = arith.constant 0 : index
    %c8 = arith.constant 8 : index
    %c0_33 = arith.constant 0 : index
    %c0_34 = arith.constant 0 : index
    %48 = vector.load %arg5[%c0_32, %c8, %c0_33, %c0_34] : memref<1x12x64x16xf32, #tpu.memory_space<vmem>>, vector<1x1x64x16xf32>
    %49 = vector.shape_cast %48 : vector<1x1x64x16xf32> to vector<64x16xf32>
    %cst_35 = arith.constant dense<0.000000e+00> : vector<5x16xf32>
    %50 = tpu.matmul %30, %49, %cst_35 {dimension_numbers = #tpu.dot_dimension_numbers<[1], [0], [0], [1], [0, 0, 1, 1], [], []>} : vector<5x64xf32>, vector<64x16xf32>, vector<5x16xf32> -> vector<5x16xf32>
    %c0_36 = arith.constant 0 : index
    %c8_37 = arith.constant 8 : index
    %c0_38 = arith.constant 0 : index
    %c0_39 = arith.constant 0 : index
    %51 = vector.load %arg6[%c0_36, %c8_37, %c0_38, %c0_39] : memref<1x12x1x16xf32, #tpu.memory_space<vmem>>, vector<1x1x1x16xf32>
    %52 = vector.shape_cast %51 : vector<1x1x1x16xf32> to vector<1x16xf32>
    %53 = vector.broadcast %52 : vector<1x16xf32> to vector<5x16xf32>
    %54 = arith.addf %50, %53 : vector<5x16xf32>
    %cst_40 = arith.constant dense<0.000000e+00> : vector<5x5xf32>
    %55 = tpu.matmul %40, %47, %cst_40 {dimension_numbers = #tpu.dot_dimension_numbers<[1], [1], [0], [0], [0, 0, 1, 0], [], []>} : vector<5x16xf32>, vector<5x16xf32>, vector<5x5xf32> -> vector<5x5xf32>
    %cst_41 = arith.constant dense<0xFF800000> : vector<5xf32>
    %56 = vector.multi_reduction <maximumf>, %55, %cst_41 [1] : vector<5x5xf32> to vector<5xf32>
    %57 = vector.shape_cast %56 : vector<5xf32> to vector<5x1xf32>
    %58 = vector.broadcast %57 : vector<5x1xf32> to vector<5x5xf32>
    %59 = arith.subf %55, %58 : vector<5x5xf32>
    %60 = math.exp %59 : vector<5x5xf32>
    %cst_42 = arith.constant dense<0.000000e+00> : vector<5xf32>
    %61 = vector.multi_reduction <add>, %60, %cst_42 [1] : vector<5x5xf32> to vector<5xf32>
    %62 = vector.shape_cast %61 : vector<5xf32> to vector<5x1xf32>
    %63 = tpu.reciprocal %62 {approx = true} : vector<5x1xf32> -> vector<5x1xf32>
    %64 = vector.broadcast %63 : vector<5x1xf32> to vector<5x5xf32>
    %65 = arith.mulf %60, %64 : vector<5x5xf32>
    %cst_43 = arith.constant dense<0.000000e+00> : vector<5x16xf32>
    %66 = tpu.matmul %65, %54, %cst_43 {dimension_numbers = #tpu.dot_dimension_numbers<[1], [0], [0], [1], [0, 0, 1, 1], [], []>} : vector<5x5xf32>, vector<5x16xf32>, vector<5x16xf32> -> vector<5x16xf32>
    %c0_44 = arith.constant 0 : index
    %c0_45 = arith.constant 0 : index
    %c0_46 = arith.constant 0 : index
    %c0_47 = arith.constant 0 : index
    %67 = vector.load %arg7[%c0_44, %c0_45, %c0_46, %c0_47] : memref<1x4x16x64xf32, #tpu.memory_space<vmem>>, vector<1x1x16x64xf32>
    %68 = vector.shape_cast %67 : vector<1x1x16x64xf32> to vector<16x64xf32>
    %cst_48 = arith.constant dense<0.000000e+00> : vector<5x64xf32>
    %69 = tpu.matmul %66, %68, %cst_48 {dimension_numbers = #tpu.dot_dimension_numbers<[1], [0], [0], [1], [0, 0, 1, 1], [], []>} : vector<5x16xf32>, vector<16x64xf32>, vector<5x64xf32> -> vector<5x64xf32>
    %70 = arith.addf %31, %69 : vector<5x64xf32>
    %c0_49 = arith.constant 0 : index
    %c1 = arith.constant 1 : index
    %c0_50 = arith.constant 0 : index
    %c0_51 = arith.constant 0 : index
    %71 = vector.load %arg5[%c0_49, %c1, %c0_50, %c0_51] : memref<1x12x64x16xf32, #tpu.memory_space<vmem>>, vector<1x1x64x16xf32>
    %72 = vector.shape_cast %71 : vector<1x1x64x16xf32> to vector<64x16xf32>
    %cst_52 = arith.constant dense<0.000000e+00> : vector<5x16xf32>
    %73 = tpu.matmul %30, %72, %cst_52 {dimension_numbers = #tpu.dot_dimension_numbers<[1], [0], [0], [1], [0, 0, 1, 1], [], []>} : vector<5x64xf32>, vector<64x16xf32>, vector<5x16xf32> -> vector<5x16xf32>
    %c0_53 = arith.constant 0 : index
    %c1_54 = arith.constant 1 : index
    %c0_55 = arith.constant 0 : index
    %c0_56 = arith.constant 0 : index
    %74 = vector.load %arg6[%c0_53, %c1_54, %c0_55, %c0_56] : memref<1x12x1x16xf32, #tpu.memory_space<vmem>>, vector<1x1x1x16xf32>
    %75 = vector.shape_cast %74 : vector<1x1x1x16xf32> to vector<1x16xf32>
    %76 = vector.broadcast %75 : vector<1x16xf32> to vector<5x16xf32>
    %77 = arith.addf %73, %76 : vector<5x16xf32>
    %cst_57 = arith.constant 2.500000e-01 : f32
    %78 = vector.broadcast %cst_57 : f32 to vector<5x16xf32>
    %79 = arith.mulf %77, %78 : vector<5x16xf32>
    %c0_58 = arith.constant 0 : index
    %c5 = arith.constant 5 : index
    %c0_59 = arith.constant 0 : index
    %c0_60 = arith.constant 0 : index
    %80 = vector.load %arg5[%c0_58, %c5, %c0_59, %c0_60] : memref<1x12x64x16xf32, #tpu.memory_space<vmem>>, vector<1x1x64x16xf32>
    %81 = vector.shape_cast %80 : vector<1x1x64x16xf32> to vector<64x16xf32>
    %cst_61 = arith.constant dense<0.000000e+00> : vector<5x16xf32>
    %82 = tpu.matmul %30, %81, %cst_61 {dimension_numbers = #tpu.dot_dimension_numbers<[1], [0], [0], [1], [0, 0, 1, 1], [], []>} : vector<5x64xf32>, vector<64x16xf32>, vector<5x16xf32> -> vector<5x16xf32>
    %c0_62 = arith.constant 0 : index
    %c5_63 = arith.constant 5 : index
    %c0_64 = arith.constant 0 : index
    %c0_65 = arith.constant 0 : index
    %83 = vector.load %arg6[%c0_62, %c5_63, %c0_64, %c0_65] : memref<1x12x1x16xf32, #tpu.memory_space<vmem>>, vector<1x1x1x16xf32>
    %84 = vector.shape_cast %83 : vector<1x1x1x16xf32> to vector<1x16xf32>
    %85 = vector.broadcast %84 : vector<1x16xf32> to vector<5x16xf32>
    %86 = arith.addf %82, %85 : vector<5x16xf32>
    %c0_66 = arith.constant 0 : index
    %c9 = arith.constant 9 : index
    %c0_67 = arith.constant 0 : index
    %c0_68 = arith.constant 0 : index
    %87 = vector.load %arg5[%c0_66, %c9, %c0_67, %c0_68] : memref<1x12x64x16xf32, #tpu.memory_space<vmem>>, vector<1x1x64x16xf32>
    %88 = vector.shape_cast %87 : vector<1x1x64x16xf32> to vector<64x16xf32>
    %cst_69 = arith.constant dense<0.000000e+00> : vector<5x16xf32>
    %89 = tpu.matmul %30, %88, %cst_69 {dimension_numbers = #tpu.dot_dimension_numbers<[1], [0], [0], [1], [0, 0, 1, 1], [], []>} : vector<5x64xf32>, vector<64x16xf32>, vector<5x16xf32> -> vector<5x16xf32>
    %c0_70 = arith.constant 0 : index
    %c9_71 = arith.constant 9 : index
    %c0_72 = arith.constant 0 : index
    %c0_73 = arith.constant 0 : index
    %90 = vector.load %arg6[%c0_70, %c9_71, %c0_72, %c0_73] : memref<1x12x1x16xf32, #tpu.memory_space<vmem>>, vector<1x1x1x16xf32>
    %91 = vector.shape_cast %90 : vector<1x1x1x16xf32> to vector<1x16xf32>
    %92 = vector.broadcast %91 : vector<1x16xf32> to vector<5x16xf32>
    %93 = arith.addf %89, %92 : vector<5x16xf32>
    %cst_74 = arith.constant dense<0.000000e+00> : vector<5x5xf32>
    %94 = tpu.matmul %79, %86, %cst_74 {dimension_numbers = #tpu.dot_dimension_numbers<[1], [1], [0], [0], [0, 0, 1, 0], [], []>} : vector<5x16xf32>, vector<5x16xf32>, vector<5x5xf32> -> vector<5x5xf32>
    %cst_75 = arith.constant dense<0xFF800000> : vector<5xf32>
    %95 = vector.multi_reduction <maximumf>, %94, %cst_75 [1] : vector<5x5xf32> to vector<5xf32>
    %96 = vector.shape_cast %95 : vector<5xf32> to vector<5x1xf32>
    %97 = vector.broadcast %96 : vector<5x1xf32> to vector<5x5xf32>
    %98 = arith.subf %94, %97 : vector<5x5xf32>
    %99 = math.exp %98 : vector<5x5xf32>
    %cst_76 = arith.constant dense<0.000000e+00> : vector<5xf32>
    %100 = vector.multi_reduction <add>, %99, %cst_76 [1] : vector<5x5xf32> to vector<5xf32>
    %101 = vector.shape_cast %100 : vector<5xf32> to vector<5x1xf32>
    %102 = tpu.reciprocal %101 {approx = true} : vector<5x1xf32> -> vector<5x1xf32>
    %103 = vector.broadcast %102 : vector<5x1xf32> to vector<5x5xf32>
    %104 = arith.mulf %99, %103 : vector<5x5xf32>
    %cst_77 = arith.constant dense<0.000000e+00> : vector<5x16xf32>
    %105 = tpu.matmul %104, %93, %cst_77 {dimension_numbers = #tpu.dot_dimension_numbers<[1], [0], [0], [1], [0, 0, 1, 1], [], []>} : vector<5x5xf32>, vector<5x16xf32>, vector<5x16xf32> -> vector<5x16xf32>
    %c0_78 = arith.constant 0 : index
    %c1_79 = arith.constant 1 : index
    %c0_80 = arith.constant 0 : index
    %c0_81 = arith.constant 0 : index
    %106 = vector.load %arg7[%c0_78, %c1_79, %c0_80, %c0_81] : memref<1x4x16x64xf32, #tpu.memory_space<vmem>>, vector<1x1x16x64xf32>
    %107 = vector.shape_cast %106 : vector<1x1x16x64xf32> to vector<16x64xf32>
    %cst_82 = arith.constant dense<0.000000e+00> : vector<5x64xf32>
    %108 = tpu.matmul %105, %107, %cst_82 {dimension_numbers = #tpu.dot_dimension_numbers<[1], [0], [0], [1], [0, 0, 1, 1], [], []>} : vector<5x16xf32>, vector<16x64xf32>, vector<5x64xf32> -> vector<5x64xf32>
    %109 = arith.addf %70, %108 : vector<5x64xf32>
    %c0_83 = arith.constant 0 : index
    %c2 = arith.constant 2 : index
    %c0_84 = arith.constant 0 : index
    %c0_85 = arith.constant 0 : index
    %110 = vector.load %arg5[%c0_83, %c2, %c0_84, %c0_85] : memref<1x12x64x16xf32, #tpu.memory_space<vmem>>, vector<1x1x64x16xf32>
    %111 = vector.shape_cast %110 : vector<1x1x64x16xf32> to vector<64x16xf32>
    %cst_86 = arith.constant dense<0.000000e+00> : vector<5x16xf32>
    %112 = tpu.matmul %30, %111, %cst_86 {dimension_numbers = #tpu.dot_dimension_numbers<[1], [0], [0], [1], [0, 0, 1, 1], [], []>} : vector<5x64xf32>, vector<64x16xf32>, vector<5x16xf32> -> vector<5x16xf32>
    %c0_87 = arith.constant 0 : index
    %c2_88 = arith.constant 2 : index
    %c0_89 = arith.constant 0 : index
    %c0_90 = arith.constant 0 : index
    %113 = vector.load %arg6[%c0_87, %c2_88, %c0_89, %c0_90] : memref<1x12x1x16xf32, #tpu.memory_space<vmem>>, vector<1x1x1x16xf32>
    %114 = vector.shape_cast %113 : vector<1x1x1x16xf32> to vector<1x16xf32>
    %115 = vector.broadcast %114 : vector<1x16xf32> to vector<5x16xf32>
    %116 = arith.addf %112, %115 : vector<5x16xf32>
    %cst_91 = arith.constant 2.500000e-01 : f32
    %117 = vector.broadcast %cst_91 : f32 to vector<5x16xf32>
    %118 = arith.mulf %116, %117 : vector<5x16xf32>
    %c0_92 = arith.constant 0 : index
    %c6 = arith.constant 6 : index
    %c0_93 = arith.constant 0 : index
    %c0_94 = arith.constant 0 : index
    %119 = vector.load %arg5[%c0_92, %c6, %c0_93, %c0_94] : memref<1x12x64x16xf32, #tpu.memory_space<vmem>>, vector<1x1x64x16xf32>
    %120 = vector.shape_cast %119 : vector<1x1x64x16xf32> to vector<64x16xf32>
    %cst_95 = arith.constant dense<0.000000e+00> : vector<5x16xf32>
    %121 = tpu.matmul %30, %120, %cst_95 {dimension_numbers = #tpu.dot_dimension_numbers<[1], [0], [0], [1], [0, 0, 1, 1], [], []>} : vector<5x64xf32>, vector<64x16xf32>, vector<5x16xf32> -> vector<5x16xf32>
    %c0_96 = arith.constant 0 : index
    %c6_97 = arith.constant 6 : index
    %c0_98 = arith.constant 0 : index
    %c0_99 = arith.constant 0 : index
    %122 = vector.load %arg6[%c0_96, %c6_97, %c0_98, %c0_99] : memref<1x12x1x16xf32, #tpu.memory_space<vmem>>, vector<1x1x1x16xf32>
    %123 = vector.shape_cast %122 : vector<1x1x1x16xf32> to vector<1x16xf32>
    %124 = vector.broadcast %123 : vector<1x16xf32> to vector<5x16xf32>
    %125 = arith.addf %121, %124 : vector<5x16xf32>
    %c0_100 = arith.constant 0 : index
    %c10 = arith.constant 10 : index
    %c0_101 = arith.constant 0 : index
    %c0_102 = arith.constant 0 : index
    %126 = vector.load %arg5[%c0_100, %c10, %c0_101, %c0_102] : memref<1x12x64x16xf32, #tpu.memory_space<vmem>>, vector<1x1x64x16xf32>
    %127 = vector.shape_cast %126 : vector<1x1x64x16xf32> to vector<64x16xf32>
    %cst_103 = arith.constant dense<0.000000e+00> : vector<5x16xf32>
    %128 = tpu.matmul %30, %127, %cst_103 {dimension_numbers = #tpu.dot_dimension_numbers<[1], [0], [0], [1], [0, 0, 1, 1], [], []>} : vector<5x64xf32>, vector<64x16xf32>, vector<5x16xf32> -> vector<5x16xf32>
    %c0_104 = arith.constant 0 : index
    %c10_105 = arith.constant 10 : index
    %c0_106 = arith.constant 0 : index
    %c0_107 = arith.constant 0 : index
    %129 = vector.load %arg6[%c0_104, %c10_105, %c0_106, %c0_107] : memref<1x12x1x16xf32, #tpu.memory_space<vmem>>, vector<1x1x1x16xf32>
    %130 = vector.shape_cast %129 : vector<1x1x1x16xf32> to vector<1x16xf32>
    %131 = vector.broadcast %130 : vector<1x16xf32> to vector<5x16xf32>
    %132 = arith.addf %128, %131 : vector<5x16xf32>
    %cst_108 = arith.constant dense<0.000000e+00> : vector<5x5xf32>
    %133 = tpu.matmul %118, %125, %cst_108 {dimension_numbers = #tpu.dot_dimension_numbers<[1], [1], [0], [0], [0, 0, 1, 0], [], []>} : vector<5x16xf32>, vector<5x16xf32>, vector<5x5xf32> -> vector<5x5xf32>
    %cst_109 = arith.constant dense<0xFF800000> : vector<5xf32>
    %134 = vector.multi_reduction <maximumf>, %133, %cst_109 [1] : vector<5x5xf32> to vector<5xf32>
    %135 = vector.shape_cast %134 : vector<5xf32> to vector<5x1xf32>
    %136 = vector.broadcast %135 : vector<5x1xf32> to vector<5x5xf32>
    %137 = arith.subf %133, %136 : vector<5x5xf32>
    %138 = math.exp %137 : vector<5x5xf32>
    %cst_110 = arith.constant dense<0.000000e+00> : vector<5xf32>
    %139 = vector.multi_reduction <add>, %138, %cst_110 [1] : vector<5x5xf32> to vector<5xf32>
    %140 = vector.shape_cast %139 : vector<5xf32> to vector<5x1xf32>
    %141 = tpu.reciprocal %140 {approx = true} : vector<5x1xf32> -> vector<5x1xf32>
    %142 = vector.broadcast %141 : vector<5x1xf32> to vector<5x5xf32>
    %143 = arith.mulf %138, %142 : vector<5x5xf32>
    %cst_111 = arith.constant dense<0.000000e+00> : vector<5x16xf32>
    %144 = tpu.matmul %143, %132, %cst_111 {dimension_numbers = #tpu.dot_dimension_numbers<[1], [0], [0], [1], [0, 0, 1, 1], [], []>} : vector<5x5xf32>, vector<5x16xf32>, vector<5x16xf32> -> vector<5x16xf32>
    %c0_112 = arith.constant 0 : index
    %c2_113 = arith.constant 2 : index
    %c0_114 = arith.constant 0 : index
    %c0_115 = arith.constant 0 : index
    %145 = vector.load %arg7[%c0_112, %c2_113, %c0_114, %c0_115] : memref<1x4x16x64xf32, #tpu.memory_space<vmem>>, vector<1x1x16x64xf32>
    %146 = vector.shape_cast %145 : vector<1x1x16x64xf32> to vector<16x64xf32>
    %cst_116 = arith.constant dense<0.000000e+00> : vector<5x64xf32>
    %147 = tpu.matmul %144, %146, %cst_116 {dimension_numbers = #tpu.dot_dimension_numbers<[1], [0], [0], [1], [0, 0, 1, 1], [], []>} : vector<5x16xf32>, vector<16x64xf32>, vector<5x64xf32> -> vector<5x64xf32>
    %148 = arith.addf %109, %147 : vector<5x64xf32>
    %c0_117 = arith.constant 0 : index
    %c3 = arith.constant 3 : index
    %c0_118 = arith.constant 0 : index
    %c0_119 = arith.constant 0 : index
    %149 = vector.load %arg5[%c0_117, %c3, %c0_118, %c0_119] : memref<1x12x64x16xf32, #tpu.memory_space<vmem>>, vector<1x1x64x16xf32>
    %150 = vector.shape_cast %149 : vector<1x1x64x16xf32> to vector<64x16xf32>
    %cst_120 = arith.constant dense<0.000000e+00> : vector<5x16xf32>
    %151 = tpu.matmul %30, %150, %cst_120 {dimension_numbers = #tpu.dot_dimension_numbers<[1], [0], [0], [1], [0, 0, 1, 1], [], []>} : vector<5x64xf32>, vector<64x16xf32>, vector<5x16xf32> -> vector<5x16xf32>
    %c0_121 = arith.constant 0 : index
    %c3_122 = arith.constant 3 : index
    %c0_123 = arith.constant 0 : index
    %c0_124 = arith.constant 0 : index
    %152 = vector.load %arg6[%c0_121, %c3_122, %c0_123, %c0_124] : memref<1x12x1x16xf32, #tpu.memory_space<vmem>>, vector<1x1x1x16xf32>
    %153 = vector.shape_cast %152 : vector<1x1x1x16xf32> to vector<1x16xf32>
    %154 = vector.broadcast %153 : vector<1x16xf32> to vector<5x16xf32>
    %155 = arith.addf %151, %154 : vector<5x16xf32>
    %cst_125 = arith.constant 2.500000e-01 : f32
    %156 = vector.broadcast %cst_125 : f32 to vector<5x16xf32>
    %157 = arith.mulf %155, %156 : vector<5x16xf32>
    %c0_126 = arith.constant 0 : index
    %c7 = arith.constant 7 : index
    %c0_127 = arith.constant 0 : index
    %c0_128 = arith.constant 0 : index
    %158 = vector.load %arg5[%c0_126, %c7, %c0_127, %c0_128] : memref<1x12x64x16xf32, #tpu.memory_space<vmem>>, vector<1x1x64x16xf32>
    %159 = vector.shape_cast %158 : vector<1x1x64x16xf32> to vector<64x16xf32>
    %cst_129 = arith.constant dense<0.000000e+00> : vector<5x16xf32>
    %160 = tpu.matmul %30, %159, %cst_129 {dimension_numbers = #tpu.dot_dimension_numbers<[1], [0], [0], [1], [0, 0, 1, 1], [], []>} : vector<5x64xf32>, vector<64x16xf32>, vector<5x16xf32> -> vector<5x16xf32>
    %c0_130 = arith.constant 0 : index
    %c7_131 = arith.constant 7 : index
    %c0_132 = arith.constant 0 : index
    %c0_133 = arith.constant 0 : index
    %161 = vector.load %arg6[%c0_130, %c7_131, %c0_132, %c0_133] : memref<1x12x1x16xf32, #tpu.memory_space<vmem>>, vector<1x1x1x16xf32>
    %162 = vector.shape_cast %161 : vector<1x1x1x16xf32> to vector<1x16xf32>
    %163 = vector.broadcast %162 : vector<1x16xf32> to vector<5x16xf32>
    %164 = arith.addf %160, %163 : vector<5x16xf32>
    %c0_134 = arith.constant 0 : index
    %c11 = arith.constant 11 : index
    %c0_135 = arith.constant 0 : index
    %c0_136 = arith.constant 0 : index
    %165 = vector.load %arg5[%c0_134, %c11, %c0_135, %c0_136] : memref<1x12x64x16xf32, #tpu.memory_space<vmem>>, vector<1x1x64x16xf32>
    %166 = vector.shape_cast %165 : vector<1x1x64x16xf32> to vector<64x16xf32>
    %cst_137 = arith.constant dense<0.000000e+00> : vector<5x16xf32>
    %167 = tpu.matmul %30, %166, %cst_137 {dimension_numbers = #tpu.dot_dimension_numbers<[1], [0], [0], [1], [0, 0, 1, 1], [], []>} : vector<5x64xf32>, vector<64x16xf32>, vector<5x16xf32> -> vector<5x16xf32>
    %c0_138 = arith.constant 0 : index
    %c11_139 = arith.constant 11 : index
    %c0_140 = arith.constant 0 : index
    %c0_141 = arith.constant 0 : index
    %168 = vector.load %arg6[%c0_138, %c11_139, %c0_140, %c0_141] : memref<1x12x1x16xf32, #tpu.memory_space<vmem>>, vector<1x1x1x16xf32>
    %169 = vector.shape_cast %168 : vector<1x1x1x16xf32> to vector<1x16xf32>
    %170 = vector.broadcast %169 : vector<1x16xf32> to vector<5x16xf32>
    %171 = arith.addf %167, %170 : vector<5x16xf32>
    %cst_142 = arith.constant dense<0.000000e+00> : vector<5x5xf32>
    %172 = tpu.matmul %157, %164, %cst_142 {dimension_numbers = #tpu.dot_dimension_numbers<[1], [1], [0], [0], [0, 0, 1, 0], [], []>} : vector<5x16xf32>, vector<5x16xf32>, vector<5x5xf32> -> vector<5x5xf32>
    %cst_143 = arith.constant dense<0xFF800000> : vector<5xf32>
    %173 = vector.multi_reduction <maximumf>, %172, %cst_143 [1] : vector<5x5xf32> to vector<5xf32>
    %174 = vector.shape_cast %173 : vector<5xf32> to vector<5x1xf32>
    %175 = vector.broadcast %174 : vector<5x1xf32> to vector<5x5xf32>
    %176 = arith.subf %172, %175 : vector<5x5xf32>
    %177 = math.exp %176 : vector<5x5xf32>
    %cst_144 = arith.constant dense<0.000000e+00> : vector<5xf32>
    %178 = vector.multi_reduction <add>, %177, %cst_144 [1] : vector<5x5xf32> to vector<5xf32>
    %179 = vector.shape_cast %178 : vector<5xf32> to vector<5x1xf32>
    %180 = tpu.reciprocal %179 {approx = true} : vector<5x1xf32> -> vector<5x1xf32>
    %181 = vector.broadcast %180 : vector<5x1xf32> to vector<5x5xf32>
    %182 = arith.mulf %177, %181 : vector<5x5xf32>
    %cst_145 = arith.constant dense<0.000000e+00> : vector<5x16xf32>
    %183 = tpu.matmul %182, %171, %cst_145 {dimension_numbers = #tpu.dot_dimension_numbers<[1], [0], [0], [1], [0, 0, 1, 1], [], []>} : vector<5x5xf32>, vector<5x16xf32>, vector<5x16xf32> -> vector<5x16xf32>
    %c0_146 = arith.constant 0 : index
    %c3_147 = arith.constant 3 : index
    %c0_148 = arith.constant 0 : index
    %c0_149 = arith.constant 0 : index
    %184 = vector.load %arg7[%c0_146, %c3_147, %c0_148, %c0_149] : memref<1x4x16x64xf32, #tpu.memory_space<vmem>>, vector<1x1x16x64xf32>
    %185 = vector.shape_cast %184 : vector<1x1x16x64xf32> to vector<16x64xf32>
    %cst_150 = arith.constant dense<0.000000e+00> : vector<5x64xf32>
    %186 = tpu.matmul %183, %185, %cst_150 {dimension_numbers = #tpu.dot_dimension_numbers<[1], [0], [0], [1], [0, 0, 1, 1], [], []>} : vector<5x16xf32>, vector<16x64xf32>, vector<5x64xf32> -> vector<5x64xf32>
    %187 = arith.addf %148, %186 : vector<5x64xf32>
    %188 = arith.addf %4, %187 : vector<5x64xf32>
    %c0_151 = arith.constant 0 : index
    %c0_152 = arith.constant 0 : index
    %c0_153 = arith.constant 0 : index
    %189 = vector.load %arg8[%c0_151, %c0_152, %c0_153] : memref<1x1x64xf32, #tpu.memory_space<vmem>>, vector<1x1x64xf32>
    %190 = vector.shape_cast %189 : vector<1x1x64xf32> to vector<1x64xf32>
    %191 = vector.broadcast %190 : vector<1x64xf32> to vector<5x64xf32>
    %192 = arith.addf %188, %191 : vector<5x64xf32>
    %c0_154 = arith.constant 0 : index
    %c0_155 = arith.constant 0 : index
    %c0_156 = arith.constant 0 : index
    %193 = vector.load %arg9[%c0_154, %c0_155, %c0_156] : memref<1x1x64xf32, #tpu.memory_space<vmem>>, vector<1x1x64xf32>
    %194 = vector.shape_cast %193 : vector<1x1x64xf32> to vector<1x64xf32>
    %c0_157 = arith.constant 0 : index
    %c0_158 = arith.constant 0 : index
    %c0_159 = arith.constant 0 : index
    %195 = vector.load %arg10[%c0_157, %c0_158, %c0_159] : memref<1x1x64xf32, #tpu.memory_space<vmem>>, vector<1x1x64xf32>
    %196 = vector.shape_cast %195 : vector<1x1x64xf32> to vector<1x64xf32>
    %cst_160 = arith.constant dense<0.000000e+00> : vector<5xf32>
    %197 = vector.multi_reduction <add>, %192, %cst_160 [1] : vector<5x64xf32> to vector<5xf32>
    %198 = vector.shape_cast %197 : vector<5xf32> to vector<5x1xf32>
    %cst_161 = arith.constant 6.400000e+01 : f32
    %199 = vector.broadcast %cst_161 : f32 to vector<5x1xf32>
    %200 = arith.divf %198, %199 : vector<5x1xf32>
    %201 = vector.broadcast %200 : vector<5x1xf32> to vector<5x64xf32>
    %202 = arith.subf %192, %201 : vector<5x64xf32>
    %203 = arith.mulf %202, %202 : vector<5x64xf32>
    %cst_162 = arith.constant dense<0.000000e+00> : vector<5xf32>
    %204 = vector.multi_reduction <add>, %203, %cst_162 [1] : vector<5x64xf32> to vector<5xf32>
    %205 = vector.shape_cast %204 : vector<5xf32> to vector<5x1xf32>
    %cst_163 = arith.constant 6.400000e+01 : f32
    %206 = vector.broadcast %cst_163 : f32 to vector<5x1xf32>
    %207 = arith.divf %205, %206 : vector<5x1xf32>
    %208 = vector.broadcast %200 : vector<5x1xf32> to vector<5x64xf32>
    %209 = arith.subf %192, %208 : vector<5x64xf32>
    %cst_164 = arith.constant 9.99999997E-7 : f32
    %210 = vector.broadcast %cst_164 : f32 to vector<5x1xf32>
    %211 = arith.addf %207, %210 : vector<5x1xf32>
    %212 = math.rsqrt %211 : vector<5x1xf32>
    %213 = vector.broadcast %212 : vector<5x1xf32> to vector<5x64xf32>
    %214 = arith.mulf %209, %213 : vector<5x64xf32>
    %215 = vector.broadcast %194 : vector<1x64xf32> to vector<5x64xf32>
    %216 = arith.mulf %214, %215 : vector<5x64xf32>
    %217 = vector.broadcast %196 : vector<1x64xf32> to vector<5x64xf32>
    %218 = arith.addf %216, %217 : vector<5x64xf32>
    %c0_165 = arith.constant 0 : index
    %c0_166 = arith.constant 0 : index
    %c0_167 = arith.constant 0 : index
    %219 = vector.load %arg11[%c0_165, %c0_166, %c0_167] : memref<1x64x256xf32, #tpu.memory_space<vmem>>, vector<1x64x256xf32>
    %220 = vector.shape_cast %219 : vector<1x64x256xf32> to vector<64x256xf32>
    %cst_168 = arith.constant dense<0.000000e+00> : vector<5x256xf32>
    %221 = tpu.matmul %218, %220, %cst_168 {dimension_numbers = #tpu.dot_dimension_numbers<[1], [0], [0], [1], [0, 0, 1, 1], [], []>} : vector<5x64xf32>, vector<64x256xf32>, vector<5x256xf32> -> vector<5x256xf32>
    %c0_169 = arith.constant 0 : index
    %c0_170 = arith.constant 0 : index
    %c0_171 = arith.constant 0 : index
    %222 = vector.load %arg12[%c0_169, %c0_170, %c0_171] : memref<1x1x256xf32, #tpu.memory_space<vmem>>, vector<1x1x256xf32>
    %223 = vector.shape_cast %222 : vector<1x1x256xf32> to vector<1x256xf32>
    %224 = vector.broadcast %223 : vector<1x256xf32> to vector<5x256xf32>
    %225 = arith.addf %221, %224 : vector<5x256xf32>
    %cst_172 = arith.constant 5.000000e-01 : f32
    %226 = vector.broadcast %cst_172 : f32 to vector<5x256xf32>
    %227 = arith.mulf %226, %225 : vector<5x256xf32>
    %cst_173 = arith.constant 4.471500e-02 : f32
    %228 = vector.broadcast %cst_173 : f32 to vector<5x256xf32>
    %229 = arith.mulf %228, %225 : vector<5x256xf32>
    %230 = arith.mulf %229, %225 : vector<5x256xf32>
    %231 = arith.mulf %230, %225 : vector<5x256xf32>
    %232 = arith.addf %225, %231 : vector<5x256xf32>
    %cst_174 = arith.constant 0.797884583 : f32
    %233 = vector.broadcast %cst_174 : f32 to vector<5x256xf32>
    %234 = arith.mulf %233, %232 : vector<5x256xf32>
    %235 = math.tanh %234 : vector<5x256xf32>
    %cst_175 = arith.constant 1.000000e+00 : f32
    %236 = vector.broadcast %cst_175 : f32 to vector<5x256xf32>
    %237 = arith.addf %236, %235 : vector<5x256xf32>
    %238 = arith.mulf %227, %237 : vector<5x256xf32>
    %c0_176 = arith.constant 0 : index
    %c0_177 = arith.constant 0 : index
    %c0_178 = arith.constant 0 : index
    %239 = vector.load %arg13[%c0_176, %c0_177, %c0_178] : memref<1x256x64xf32, #tpu.memory_space<vmem>>, vector<1x256x64xf32>
    %240 = vector.shape_cast %239 : vector<1x256x64xf32> to vector<256x64xf32>
    %cst_179 = arith.constant dense<0.000000e+00> : vector<5x64xf32>
    %241 = tpu.matmul %238, %240, %cst_179 {dimension_numbers = #tpu.dot_dimension_numbers<[1], [0], [0], [1], [0, 0, 1, 1], [], []>} : vector<5x256xf32>, vector<256x64xf32>, vector<5x64xf32> -> vector<5x64xf32>
    %c0_180 = arith.constant 0 : index
    %c0_181 = arith.constant 0 : index
    %c0_182 = arith.constant 0 : index
    %242 = vector.load %arg14[%c0_180, %c0_181, %c0_182] : memref<1x1x64xf32, #tpu.memory_space<vmem>>, vector<1x1x64xf32>
    %243 = vector.shape_cast %242 : vector<1x1x64xf32> to vector<1x64xf32>
    %244 = vector.broadcast %243 : vector<1x64xf32> to vector<5x64xf32>
    %245 = arith.addf %241, %244 : vector<5x64xf32>
    %246 = arith.addf %192, %245 : vector<5x64xf32>
    %c0_183 = arith.constant 0 : index
    %c0_184 = arith.constant 0 : index
    %c0_185 = arith.constant 0 : index
    %247 = vector.load %arg15[%c0_183, %c0_184, %c0_185] : memref<1x5x64xf32, #tpu.memory_space<vmem>>, vector<1x5x64xf32>
    %248 = vector.shape_cast %247 : vector<1x5x64xf32> to vector<5x64xf32>
    %249 = vector.shape_cast %246 : vector<5x64xf32> to vector<1x5x64xf32>
    tpu.vector_store %arg15[%c0_183, %c0_184, %c0_185], %249 {strides = array<i32>} : memref<1x5x64xf32, #tpu.memory_space<vmem>>, vector<1x5x64xf32>,
    return
  }
  func.func @transform_0(%arg0: i32, %arg1: i32) -> (i32, i32, i32) {
    %c0_i32 = arith.constant 0 : i32
    %c0_i32_0 = arith.constant 0 : i32
    %c0_i32_1 = arith.constant 0 : i32
    return %arg0, %c0_i32, %c0_i32_0 : i32, i32, i32
  }
  func.func @transform_1(%arg0: i32, %arg1: i32) -> (i32, i32, i32) {
    %c0_i32 = arith.constant 0 : i32
    %c0_i32_0 = arith.constant 0 : i32
    %c0_i32_1 = arith.constant 0 : i32
    return %arg1, %c0_i32, %c0_i32_0 : i32, i32, i32
  }
  func.func @transform_2(%arg0: i32, %arg1: i32) -> (i32, i32, i32) {
    %c0_i32 = arith.constant 0 : i32
    %c0_i32_0 = arith.constant 0 : i32
    %c0_i32_1 = arith.constant 0 : i32
    return %arg1, %c0_i32, %c0_i32_0 : i32, i32, i32
  }
  func.func @transform_3(%arg0: i32, %arg1: i32) -> (i32, i32, i32, i32) {
    %c0_i32 = arith.constant 0 : i32
    %c0_i32_0 = arith.constant 0 : i32
    %c0_i32_1 = arith.constant 0 : i32
    %c0_i32_2 = arith.constant 0 : i32
    return %arg1, %c0_i32, %c0_i32_0, %c0_i32_1 : i32, i32, i32, i32
  }
  func.func @transform_4(%arg0: i32, %arg1: i32) -> (i32, i32, i32, i32) {
    %c0_i32 = arith.constant 0 : i32
    %c0_i32_0 = arith.constant 0 : i32
    %c0_i32_1 = arith.constant 0 : i32
    %c0_i32_2 = arith.constant 0 : i32
    return %arg1, %c0_i32, %c0_i32_0, %c0_i32_1 : i32, i32, i32, i32
  }
  func.func @transform_5(%arg0: i32, %arg1: i32) -> (i32, i32, i32, i32) {
    %c0_i32 = arith.constant 0 : i32
    %c0_i32_0 = arith.constant 0 : i32
    %c0_i32_1 = arith.constant 0 : i32
    %c0_i32_2 = arith.constant 0 : i32
    return %arg1, %c0_i32, %c0_i32_0, %c0_i32_1 : i32, i32, i32, i32
  }
  func.func @transform_6(%arg0: i32, %arg1: i32) -> (i32, i32, i32) {
    %c0_i32 = arith.constant 0 : i32
    %c0_i32_0 = arith.constant 0 : i32
    %c0_i32_1 = arith.constant 0 : i32
    return %arg1, %c0_i32, %c0_i32_0 : i32, i32, i32
  }
  func.func @transform_7(%arg0: i32, %arg1: i32) -> (i32, i32, i32) {
    %c0_i32 = arith.constant 0 : i32
    %c0_i32_0 = arith.constant 0 : i32
    %c0_i32_1 = arith.constant 0 : i32
    return %arg1, %c0_i32, %c0_i32_0 : i32, i32, i32
  }
  func.func @transform_8(%arg0: i32, %arg1: i32) -> (i32, i32, i32) {
    %c0_i32 = arith.constant 0 : i32
    %c0_i32_0 = arith.constant 0 : i32
    %c0_i32_1 = arith.constant 0 : i32
    return %arg1, %c0_i32, %c0_i32_0 : i32, i32, i32
  }
  func.func @transform_9(%arg0: i32, %arg1: i32) -> (i32, i32, i32) {
    %c0_i32 = arith.constant 0 : i32
    %c0_i32_0 = arith.constant 0 : i32
    %c0_i32_1 = arith.constant 0 : i32
    return %arg1, %c0_i32, %c0_i32_0 : i32, i32, i32
  }
  func.func @transform_10(%arg0: i32, %arg1: i32) -> (i32, i32, i32) {
    %c0_i32 = arith.constant 0 : i32
    %c0_i32_0 = arith.constant 0 : i32
    %c0_i32_1 = arith.constant 0 : i32
    return %arg1, %c0_i32, %c0_i32_0 : i32, i32, i32
  }
  func.func @transform_11(%arg0: i32, %arg1: i32) -> (i32, i32, i32) {
    %c0_i32 = arith.constant 0 : i32
    %c0_i32_0 = arith.constant 0 : i32
    %c0_i32_1 = arith.constant 0 : i32
    return %arg1, %c0_i32, %c0_i32_0 : i32, i32, i32
  }
  func.func @transform_12(%arg0: i32, %arg1: i32) -> (i32, i32, i32) {
    %c0_i32 = arith.constant 0 : i32
    %c0_i32_0 = arith.constant 0 : i32
    %c0_i32_1 = arith.constant 0 : i32
    return %arg1, %c0_i32, %c0_i32_0 : i32, i32, i32
  }
  func.func @transform_13(%arg0: i32, %arg1: i32) -> (i32, i32, i32) {
    %c0_i32 = arith.constant 0 : i32
    %c0_i32_0 = arith.constant 0 : i32
    %c0_i32_1 = arith.constant 0 : i32
    return %arg0, %c0_i32, %c0_i32_0 : i32, i32, i32
  }
}

</mosaic_0001>

<bundles_post_ra>
// kernel: _lambda_.3
= control target key start
LH: loop header
LB: loop body
LE: loop exit
PB: predicated region body
PF: predicated region fallthrough
CT: control target
= control target key end

     0   :  { %vm24_vm0 = vcmask 517120   ;;  %s289_s0 = inlined_call_operand.vmem [shape: f32[2,64], index: 0, kind: input, shape index: {}]   ;;  %s290_s1 = inlined_call_operand.vmem [shape: f32[1,64], index: 1, kind: input, shape index: {}]   ;;  %s291_s2 = inlined_call_operand.vmem [shape: f32[1,64], index: 2, kind: input, shape index: {}]   ;;  %s292_s3 = inlined_call_operand.vmem [shape: f32[64,10], index: 3, kind: input, shape index: {}]   ;;  %s293_s4 = inlined_call_operand.vmem [shape: f32[1,10], index: 4, kind: input, shape index: {}]   ;;  %s294_s5 = inlined_call_operand.hbm [shape: f32[2,10], index: 5, kind: output, shape index: {}]  }
   0x1   :  { %v21_v0 = vld [vmem:[%s289_s0] sm:$0x3] }
   0x2   :  { %10 = vsyncpa [#allocation3], 0  ;;  %v25_v1 = vsel %vm24_vm0, %v21_v0, 0.0  ;;  %v60_v7 = vld [vmem:[%s292_s3 + $0x38] sm:$0xff]  ;;  %v217_v8 = vmov 0.0   ;;  %v59_v9 = vld [vmem:[%s292_s3 + $0x30] sm:$0xff] }
   0x3   :  { %26 = vadd.xlane.f32.xlu0 %v25_v1  ;;  %171 = vmatprep.subr.mxu0 %v217_v8  ;;  %vm218_vm1 = vmmov 0   ;;  %v58_v10 = vld [vmem:[%s292_s3 + $0x28] sm:$0xff]  ;;  %v57_v11 = vld [vmem:[%s292_s3 + $0x20] sm:$0xff]  ;;  %v56_v12 = vld [vmem:[%s292_s3 + $0x18] sm:$0xff]  ;;  %vm68_vm2 = vcmask 523264   ;;  %s219_s15 = smov [#allocation2]  }
   0x4   :  { %187 = vmatprep.mubr.msk.f32.mxu0 %vm218_vm1, %v217_v8  ;;  %172 = vmatpush3.msra.mxu0 %v60_v7  ;;  %v55_v13 = vld [vmem:[%s292_s3 + $0x10] sm:$0xff]  ;;  %v54_v14 = vld [vmem:[%s292_s3 + $0x8] sm:$0xff]  ;;  %v53_v15 = vld [vmem:[%s292_s3] sm:$0xff]  ;;  %s150_s16 = sshll.u32 %s219_s15, 4  ;;  %vm142_vm3 = vcmask 74752   ;;  %s151_s16 = int_to_ptr.vmem [resolvable:$true] %s150_s16 }
   0x5   :  { %173 = vmatprep.subr.mxu0 %v217_v8  ;;  %v158_v20 = vld [vmem:[%s290_s1] ss:$0 sm:$0xff]  ;;  %s195_s1 = scalar_lea.vmem %s151_s16, 32  ;;  %p200_p1 = scmp.lt.s32.totalorder %s151_s16, %s151_s16 }
   0x6   :  { %174 = vmatpush3.msra.mxu0 %v59_v9  ;;  %v159_v22 = vld [vmem:[%s291_s2] ss:$0 sm:$0xff]  ;;  %p196_p0 = scmp.ne.s32.totalorder %s151_s16, %s195_s1  ;;  %p201_p2 = scmp.lt.s32.totalorder %s195_s1, %s195_s1 }
   0x7   :  { %175 = vmatprep.subr.mxu0 %v217_v8  ;;  %v160_v25 = vld [vmem:[%s293_s4] ss:$0 sm:$0xff] }
   0x8   :  { %176 = vmatpush3.msra.mxu0 %v58_v10  ;;  %p202_p3 = por %p201_p2, %p200_p1 }
   0x9   :  { %177 = vmatprep.subr.mxu0 %v217_v8 }
   0xa   :  { %178 = vmatpush3.msra.mxu0 %v57_v11  ;;  %p203_p4 = pnand %p202_p3, %p196_p0 }
   0xb   :  { %179 = vmatprep.subr.mxu0 %v217_v8 }
   0xc   :  { %180 = vmatpush3.msra.mxu0 %v56_v12 }
   0xd   :  { %181 = vmatprep.subr.mxu0 %v217_v8 }
   0xe   :  { %182 = vmatpush3.msra.mxu0 %v55_v13 }
   0xf   :  { %183 = vmatprep.subr.mxu0 %v217_v8 }
  0x10   :  { %184 = vmatpush3.msra.mxu0 %v54_v14 }
  0x11   :  { %185 = vmatprep.subr.mxu0 %v217_v8 }
  0x12   :  { %186 = vmatpush3.msra.mxu0 %v53_v15 }
  0x8c   :  { %v27_v2 = vpop.xlane.xlu0 %26 }
  0x8d   :  { %v29_v3 = vmul.f32 0.015625, %v27_v2 }
  0x8f   :  { %v30_v4 = vsub.f32 %v21_v0, %v29_v3 }
  0x91   :  { %v31_v5 = vmul.f32 %v30_v4, %v30_v4 }
  0x93   :  { %v32_v6 = vsel %vm24_vm0, %v31_v5, 0.0 }
  0x94   :  { %33 = vadd.xlane.f32.xlu0 %v32_v6 }
 0x11d   :  { %v34_v16 = vpop.xlane.xlu0 %33 }
 0x11e   :  { %v35_v17 = vmul.f32 0.015625, %v34_v16 }
 0x120   :  { %v36_v18 = vadd.f32 1e-06, %v35_v17 }
 0x122   :  { %193 = vrsqrt.f32 %v36_v18 }
 0x12f   :  { %v194_v19 = vpop.eup %193 }
 0x130   :  { %v38_v21 = vmul.f32 %v194_v19, %v30_v4 }
 0x132   :  { %v45_v23 = vmul.f32 %v158_v20, %v38_v21 }
 0x134   :  { %v52_v24 = vadd.f32 %v159_v22, %v45_v23 }
 0x136   :  { %188 = vmatmul.mubr.msk.f32.vlgmr.msra.gmra.mxu0 %vm68_vm2, %v52_v24 }
 0x1f6   :  { %v138_v26 = vpop.f32.mrf.mxu0 }
 0x1f7   :  { %v139_v27 = vadd.f32 %v160_v25, %v138_v26 }
 0x1f8   :  { %v189_v28 = vpop.f32.mrf.mxu0 }
 0x1f9   :  { %143 = vst.msk [vmem:[#allocation2] sm:$0x3] %vm142_vm3, %v139_v27 }
 0x1fa   :  { %206 = shalt.err (!%p203_p4)
}
 0x1fb   :  { %153 = dma.vmem_to_hbm [thread:$0]  %s151_s16, 32, %s294_s5, [#allocation3]  }
 0x1fc   :  { %215 = dma.done.wait [#allocation3], 32  }
 0x1fd   :  { %216 = vsyncadd [#allocation3], 4294967264 }
 0x1fe   :  { %157 = vsyncpa [#allocation3], 1 }

// kernel: _lambda_.2
= control target key start
LH: loop header
LB: loop body
LE: loop exit
PB: predicated region body
PF: predicated region fallthrough
CT: control target
= control target key end

     0   :  { %s3980_s25 = smov 0   ;;  %s3982_s26 = smov 0   ;;  %s4542_s0 = inlined_call_operand.vmem [shape: f32[2,5,64], index: 0, kind: input, shape index: {}]   ;;  %s4543_s1 = inlined_call_operand.vmem [shape: f32[2,1,64], index: 1, kind: input, shape index: {}]   ;;  %s4544_s2 = inlined_call_operand.vmem [shape: f32[2,1,64], index: 2, kind: input, shape index: {}]   ;;  %s4545_s3 = inlined_call_operand.vmem [shape: f32[2,12,64,16], index: 3, kind: input, shape index: {}]   ;;  %s4546_s4 = inlined_call_operand.vmem [shape: f32[2,12,1,16], index: 4, kind: input, shape index: {}]   ;;  %s4547_s5 = inlined_call_operand.vmem [shape: f32[2,4,16,64], index: 5, kind: input, shape index: {}]   ;;  %s4548_s6 = inlined_call_operand.vmem [shape: f32[2,1,64], index: 6, kind: input, shape index: {}]   ;;  %s4549_s7 = inlined_call_operand.vmem [shape: f32[2,1,64], index: 7, kind: input, shape index: {}]   ;;  %s4550_s8 = inlined_call_operand.vmem [shape: f32[2,1,64], index: 8, kind: input, shape index: {}]   ;;  %s4551_s9 = inlined_call_operand.vmem [shape: f32[2,64,256], index: 9, kind: input, shape index: {}]   ;;  %s4552_s10 = inlined_call_operand.vmem [shape: f32[2,1,256], index: 10, kind: input, shape index: {}]   ;;  %s4553_s11 = inlined_call_operand.vmem [shape: f32[2,256,64], index: 11, kind: input, shape index: {}]   ;;  %s4554_s12 = inlined_call_operand.vmem [shape: f32[2,1,64], index: 12, kind: input, shape index: {}]   ;;  %s4555_s13 = inlined_call_operand.vmem [shape: f32[2,5,64], index: 13, kind: output, shape index: {}]  }
   0x1   :  { %4560 = sst [smem:[#allocation8_spill]] %s4542_s0  ;;  %s3984_s27 = smov 0  }
   0x2   :  { %4561 = sst [smem:[#allocation9_spill]] %s4543_s1  ;;  %s3986_s28 = smov 0  }
   0x3   :  { %4562 = sst [smem:[#allocation10_spill]] %s4544_s2  ;;  %s3988_s29 = smov 0  }
   0x4   :  { %4563 = sst [smem:[#allocation11_spill]] %s4545_s3 }
   0x5   :  { %4564 = sst [smem:[#allocation12_spill]] %s4546_s4 }
   0x6   :  { %4565 = sst [smem:[#allocation13_spill]] %s4547_s5 }
   0x7 LB: > { %4566 = sst [smem:[#allocation2_spill]] %s3890_s25  ;;  %s32_s30 = sadd.s32 1, %s3898_s27  ;;  %s3906_s29 = sphi %s3988_s29, %s23_s29   ;;  %s3902_s28 = sphi %s3986_s28, %s4590_s28   ;;  %s3898_s27 = sphi %s3984_s27, %s4589_s27   ;;  %s3894_s26 = sphi %s3982_s26, %s4588_s26   ;;  %s3890_s25 = sphi %s3980_s25, %s4587_s25  }
   0x8   : > { %4567 = sst [smem:[#allocation3_spill]] %s3898_s27  ;;  %s35_s14 = sadd.s32 1, %s3902_s28 }
   0x9   : > { %4568 = sst [smem:[#allocation4_spill]] %s3902_s28  ;;  %p33_p0 = scmp.ge.s32.totalorder %s32_s30, 2 }
   0xa   : > { %4569 = sst [smem:[#allocation5_spill]] %s3906_s29  ;;  %p3159_p1 = scmp.ge.s32.totalorder %s3906_s29, 1 }
   0xb   : > { %p504_p2 = scmp.lt.s32.totalorder %s3906_s29, 5  ;;  %s4592_s30 = smov (%p33_p0, %s32_s30), 0 }
   0xc   : > { %4570 = sst [smem:[#allocation6_spill]] %s4592_s30  ;;  %s4594_s14 = smov (!%p33_p0, %s35_s14), %s3902_s28 }
   0xd   : > { %p505_p3 = pnand %p3159_p1, %p504_p2  ;;  %p37_p4 = scmp.ge.s32.totalorder %s4594_s14, 2 }
   0xe   : > { %p592_p5 = scmp.lt.s32.totalorder (!%p505_p3), %s3894_s26, 1  ;;  %p596_p6 = scmp.lt.s32.totalorder (!%p505_p3), %s3890_s25, 1 }
   0xf   : > { %s4596_s14 = smov (%p37_p4, %s4594_s14), 0  ;;  %508 = sbr.rel (%p505_p3) target bundleno = 4732 (0x127c), region = 72 }
  0x10   : > { %4571 = sst [smem:[#allocation7_spill]] %s4596_s14 }
  0x11   : > { %s4572_s0 = sld [smem:[#allocation8_spill]] (!%p505_p3) }
  0x12   : > { %s4575_s3 = sld [smem:[#allocation11_spill]] (!%p505_p3) }
  0x13   : > { %s4576_s5 = sld [smem:[#allocation13_spill]] (!%p505_p3) }
  0x14   : > { %s4598_s26 = smov (!%p592_p5, %s3894_s26), 1  ;;  %s4577_s4 = sld [smem:[#allocation12_spill]] }
  0x15   : > { %s4014_s15 = scalar_select %p596_p6, %s3890_s25, 1 }
  0x16   : > { %s3160_s16 = sshll.u32 %s4598_s26, 3 }
  0x17   : > { %s595_s19 = scalar_lea.vmem %s4572_s0, %s3160_s16  ;;  %s3799_s30 = smul.u32 768, %s4014_s15 }
  0x18   : > { %s3800_s28 = smul.u32 12, %s4014_s15  ;;  %s3329_s27 = sshll.u32 %s4014_s15, 6 }
  0x19   : > { %s4033_s26 = scalar_lea.vmem %s4575_s3, %s3799_s30  ;;  %s4038_s0 = scalar_lea.vmem %s4576_s5, %s3329_s27 }
  0x1a   : > { %s4043_s22 = scalar_lea.vmem %s4577_s4, %s3800_s28  ;;  %s3330_s17 = sshll.u32 %s4014_s15, 7 }
  0x1b   : > { %s3166_s27 = sshll.u32 %s4014_s15, 1  ;;  %s4062_s20 = scalar_lea.vmem %s4551_s9, %s3330_s17 }
  0x1c   : > { %s4067_s23 = scalar_lea.vmem %s4552_s10, %s3166_s27  ;;  %s3331_s24 = sshll.u32 %s4014_s15, 8 }
  0x1d   : > { %s641_s2 = scalar_lea.vmem %s4554_s12, %s4014_s15  ;;  %s4077_s30 = scalar_lea.vmem %s4553_s11, %s3331_s24 }
  0x1e   : > { %s4082_s5 = scalar_lea.vmem %s4555_s13, %s3160_s16  ;;  %s4578_s17 = sld [smem:[#allocation2_spill]] }
  0x24   : > { %p3170_p7 = scmp.ne.s32.totalorder %s4578_s17, 0 }
  0x26   : > { %649 = sbr.rel (%p3170_p7) target bundleno = 45 (0x2d), region = 76 }
  0x2b   : > { %v650_v0 = vld [vmem:[%s595_s19] sm:$0x1f]  ;;  %vm651_vm0 = vcmask 520192  }
  0x2c   : > { %652 = vst.msk [vmem:[%s4082_s5] sm:$0x1f] %vm651_vm0, %v650_v0 }
  0x2d PF: > { %vm656_vm1 = vcmask 520192   ;;  %v3908_v8 = vmov 0.0   ;;  %v692_v9 = vld [vmem:[%s4033_s26 + $0x38] sm:$0xff]  ;;  %v691_v11 = vld [vmem:[%s4033_s26 + $0x30] sm:$0xff]  ;;  %v690_v13 = vld [vmem:[%s4033_s26 + $0x28] sm:$0xff]  ;;  %vm3909_vm2 = vmmov 0   ;;  %s4583_s28 = scalar_lea.vmem %s4548_s6, %s4014_s15  ;;  %s4584_s24 = scalar_lea.vmem %s4549_s7, %s4014_s15 }
  0x2e   : > { %3503 = vmatprep.subr.mxu0 %v3908_v8  ;;  %3522 = vmatprep.subr.mxu1 %v3908_v8  ;;  %v3182_v10 = vld [vmem:[%s4033_s26 + $0x138] sm:$0xff]  ;;  %v3181_v12 = vld [vmem:[%s4033_s26 + $0x130] sm:$0xff]  ;;  %v3180_v14 = vld [vmem:[%s4033_s26 + $0x128] sm:$0xff]  ;;  %s4579_s14 = sld [smem:[#allocation9_spill]]  ;;  %vm700_vm3 = vcmask 523264   ;;  %vm949_vm4 = vcmask 130048   ;;  %s4585_s29 = scalar_lea.vmem %s4550_s8, %s4014_s15 }
  0x2f   : > { %3504 = vmatpush3.msra.mxu0 %v692_v9  ;;  %3523 = vmatpush3.msra.mxu1 %v3182_v10  ;;  %v689_v15 = vld [vmem:[%s4033_s26 + $0x20] sm:$0xff]  ;;  %v688_v17 = vld [vmem:[%s4033_s26 + $0x18] sm:$0xff]  ;;  %v687_v19 = vld [vmem:[%s4033_s26 + $0x10] sm:$0xff]  ;;  %s4581_s27 = sld [smem:[#allocation10_spill]]  ;;  %vm1042_vm5 = vcmask 1044480   ;;  %vm1026_vm6 = vcmask 36864  }
  0x30   : > { %3505 = vmatprep.subr.mxu0 %v3908_v8  ;;  %3524 = vmatprep.subr.mxu1 %v3908_v8  ;;  %v3179_v16 = vld [vmem:[%s4033_s26 + $0x120] sm:$0xff]  ;;  %v3178_v18 = vld [vmem:[%s4033_s26 + $0x118] sm:$0xff]  ;;  %v3177_v20 = vld [vmem:[%s4033_s26 + $0x110] sm:$0xff]  ;;  %vm1038_vm7 = vcmask 39936  }
  0x31   : > { %3506 = vmatpush3.msra.mxu0 %v691_v11  ;;  %3525 = vmatpush3.msra.mxu1 %v3181_v12  ;;  %v686_v21 = vld [vmem:[%s4033_s26 + $0x8] sm:$0xff]  ;;  %v685_v23 = vld [vmem:[%s4033_s26] sm:$0xff]  ;;  %v3193_v34 = vld [vmem:[%s4033_s26 + $0x238] sm:$0xff] }
  0x32   : > { %3507 = vmatprep.subr.mxu0 %v3908_v8  ;;  %3526 = vmatprep.subr.mxu1 %v3908_v8  ;;  %v3176_v22 = vld [vmem:[%s4033_s26 + $0x108] sm:$0xff]  ;;  %v3175_v24 = vld [vmem:[%s4033_s26 + $0x100] sm:$0xff]  ;;  %v3208_v35 = vld [vmem:[%s4033_s26 + $0x78] sm:$0xff] }
  0x33   : > { %v653_v1 = vld [vmem:[%s4082_s5] sm:$0x1f]  ;;  %3508 = vmatpush3.msra.mxu0 %v690_v13  ;;  %3527 = vmatpush3.msra.mxu1 %v3180_v14  ;;  %v3192_v36 = vld [vmem:[%s4033_s26 + $0x230] sm:$0xff]  ;;  %v3191_v38 = vld [vmem:[%s4033_s26 + $0x228] sm:$0xff] }
  0x34   : > { %v657_v2 = vsel %vm656_vm1, %v653_v1, 0.0  ;;  %3509 = vmatprep.subr.mxu0 %v3908_v8  ;;  %3528 = vmatprep.subr.mxu1 %v3908_v8  ;;  %s4580_s16 = scalar_lea.vmem %s4579_s14, %s4014_s15  ;;  %v3207_v37 = vld [vmem:[%s4033_s26 + $0x70] sm:$0xff]  ;;  %v3206_v39 = vld [vmem:[%s4033_s26 + $0x68] sm:$0xff]  ;;  %v3190_v40 = vld [vmem:[%s4033_s26 + $0x220] sm:$0xff] }
  0x35   : > { %658 = vadd.xlane.f32.xlu0 %v657_v2  ;;  %3510 = vmatpush3.msra.mxu0 %v689_v15  ;;  %v3171_v29 = vld [vmem:[%s4580_s16] ss:$0 sm:$0xff]  ;;  %s4582_s18 = scalar_lea.vmem %s4581_s27, %s4014_s15  ;;  %v3189_v42 = vld [vmem:[%s4033_s26 + $0x218] sm:$0xff]  ;;  %v3188_v44 = vld [vmem:[%s4033_s26 + $0x210] sm:$0xff] }
  0x36   : > { %3529 = vmatpush3.msra.mxu1 %v3179_v16  ;;  %3511 = vmatprep.subr.mxu0 %v3908_v8  ;;  %v3172_v31 = vld [vmem:[%s4582_s18] ss:$0 sm:$0xff]  ;;  %v3204_v43 = vld [vmem:[%s4033_s26 + $0x58] sm:$0xff]  ;;  %v3203_v45 = vld [vmem:[%s4033_s26 + $0x50] sm:$0xff] }
  0x37   : > { %3530 = vmatprep.subr.mxu1 %v3908_v8  ;;  %3512 = vmatpush3.msra.mxu0 %v688_v17  ;;  %v3205_v41 = vld [vmem:[%s4033_s26 + $0x60] sm:$0xff]  ;;  %v3187_v46 = vld [vmem:[%s4033_s26 + $0x208] sm:$0xff]  ;;  %v3230_v50 = vld [vmem:[%s4033_s26 + $0x278] sm:$0xff] }
  0x38   : > { %3531 = vmatpush3.msra.mxu1 %v3178_v18  ;;  %3513 = vmatprep.subr.mxu0 %v3908_v8  ;;  %v3202_v47 = vld [vmem:[%s4033_s26 + $0x48] sm:$0xff]  ;;  %v3186_v48 = vld [vmem:[%s4033_s26 + $0x200] sm:$0xff]  ;;  %v3229_v51 = vld [vmem:[%s4033_s26 + $0x270] sm:$0xff] }
  0x39   : > { %3532 = vmatprep.subr.mxu1 %v3908_v8  ;;  %3514 = vmatpush3.msra.mxu0 %v687_v19  ;;  %v3201_v49 = vld [vmem:[%s4033_s26 + $0x40] sm:$0xff]  ;;  %v3228_v52 = vld [vmem:[%s4033_s26 + $0x268] sm:$0xff]  ;;  %v3226_v54 = vld [vmem:[%s4033_s26 + $0x258] sm:$0xff] }
  0x3a   : > { %3533 = vmatpush3.msra.mxu1 %v3177_v20  ;;  %3515 = vmatprep.subr.mxu0 %v3908_v8  ;;  %v3227_v53 = vld [vmem:[%s4033_s26 + $0x260] sm:$0xff]  ;;  %v3225_v55 = vld [vmem:[%s4033_s26 + $0x250] sm:$0xff]  ;;  %v3224_v56 = vld [vmem:[%s4033_s26 + $0x248] sm:$0xff] }
  0x3b   : > { %3534 = vmatprep.subr.mxu1 %v3908_v8  ;;  %3516 = vmatpush3.msra.mxu0 %v686_v21  ;;  %v3223_v57 = vld [vmem:[%s4033_s26 + $0x240] sm:$0xff]  ;;  %v1117_v20 = vld [vmem:[%s4038_s0 + $0x8] sm:$0xff] }
  0x3c   : > { %3535 = vmatpush3.msra.mxu1 %v3176_v22  ;;  %3517 = vmatprep.subr.mxu0 %v3908_v8  ;;  %v3173_v58 = vld [vmem:[%s4043_s22] ss:$0 sm:$0xff]  ;;  %v3184_v59 = vld [vmem:[%s4043_s22 + $0x4] ss:$0 sm:$0xff] }
  0x3d   : > { %3536 = vmatprep.subr.mxu1 %v3908_v8  ;;  %3518 = vmatpush3.msra.mxu0 %v685_v23  ;;  %v1116_v21 = vld [vmem:[%s4038_s0] sm:$0xff] }
  0x3e   : > { %3537 = vmatpush3.msra.mxu1 %v3175_v24  ;;  %3519 = vmatprep.mubr.msk.f32.mxu0 %vm3909_vm2, %v3908_v8 }
  0x3f   : > { %3538 = vmatprep.mubr.msk.f32.mxu1 %vm3909_vm2, %v3908_v8  ;;  %3541 = vmatprep.subr.mxu0 %v3908_v8 }
  0x40   : > { %3570 = vmatprep.subr.mxu1 %v3908_v8 }
  0xbe   : > { %v659_v3 = vpop.xlane.xlu0 %658 }
  0xbf   : > { %v661_v4 = vmul.f32 0.015625, %v659_v3  ;;  %v3195_v3 = vld [vmem:[%s4043_s22 + $0x8] ss:$0 sm:$0xff] }
  0xc1   : > { %v4088_v5 = vsub.f32 %v653_v1, %v661_v4 }
  0xc3   : > { %v663_v6 = vmul.f32 %v4088_v5, %v4088_v5 }
  0xc5   : > { %v664_v7 = vsel %vm656_vm1, %v663_v6, 0.0 }
  0xc6   : > { %665 = vadd.xlane.f32.xlu0 %v664_v7 }
 0x14f   : > { %v666_v25 = vpop.xlane.xlu0 %665 }
 0x150   : > { %v667_v26 = vmul.f32 0.015625, %v666_v25  ;;  %v3219_v25 = vld [vmem:[%s4033_s26 + $0x178] sm:$0xff] }
 0x152   : > { %v668_v27 = vadd.f32 1e-06, %v667_v26  ;;  %v3218_v26 = vld [vmem:[%s4033_s26 + $0x170] sm:$0xff] }
 0x154   : > { %3843 = vrsqrt.f32 %v668_v27  ;;  %v3217_v27 = vld [vmem:[%s4033_s26 + $0x168] sm:$0xff] }
 0x161   : > { %v3844_v28 = vpop.eup %3843 }
 0x162   : > { %v670_v30 = vmul.f32 %v3844_v28, %v4088_v5  ;;  %v3216_v28 = vld [vmem:[%s4033_s26 + $0x160] sm:$0xff] }
 0x164   : > { %v677_v32 = vmul.f32 %v3171_v29, %v670_v30  ;;  %v3215_v29 = vld [vmem:[%s4033_s26 + $0x158] sm:$0xff]  ;;  %v3214_v30 = vld [vmem:[%s4033_s26 + $0x150] sm:$0xff] }
 0x166   : > { %v4142_v33 = vadd.f32 %v3172_v31, %v677_v32  ;;  %v3213_v31 = vld [vmem:[%s4033_s26 + $0x148] sm:$0xff]  ;;  %v3212_v32 = vld [vmem:[%s4033_s26 + $0x140] sm:$0xff] }
 0x168   : > { %3520 = vmatmul.mubr.msk.f32.vlgmr.msra.gmra.mxu0 %vm700_vm3, %v4142_v33  ;;  %3539 = vmatmul.mubr.msk.f32.vlgmr.msra.gmra.mxu1 %vm700_vm3, %v4142_v33 }
 0x169   : > { %3542 = vmatpush3.msra.mxu0 %v3193_v34  ;;  %3571 = vmatpush3.msra.mxu1 %v3208_v35  ;;  %v3260_v34 = vld [vmem:[%s4033_s26 + $0x1b8] sm:$0xff] }
 0x16a   : > { %3543 = vmatprep.subr.mxu0 %v3908_v8  ;;  %3572 = vmatprep.subr.mxu1 %v3908_v8 }
 0x16b   : > { %3544 = vmatpush3.msra.mxu0 %v3192_v36  ;;  %3573 = vmatpush3.msra.mxu1 %v3207_v37  ;;  %v3259_v36 = vld [vmem:[%s4033_s26 + $0x1b0] sm:$0xff] }
 0x16c   : > { %3545 = vmatprep.subr.mxu0 %v3908_v8  ;;  %3574 = vmatprep.subr.mxu1 %v3908_v8 }
 0x16d   : > { %3546 = vmatpush3.msra.mxu0 %v3191_v38  ;;  %3575 = vmatpush3.msra.mxu1 %v3206_v39  ;;  %v3258_v38 = vld [vmem:[%s4033_s26 + $0x1a8] sm:$0xff]  ;;  %v3257_v39 = vld [vmem:[%s4033_s26 + $0x1a0] sm:$0xff] }
 0x16e   : > { %3547 = vmatprep.subr.mxu0 %v3908_v8  ;;  %3576 = vmatprep.subr.mxu1 %v3908_v8 }
 0x16f   : > { %3548 = vmatpush3.msra.mxu0 %v3190_v40  ;;  %3577 = vmatpush3.msra.mxu1 %v3205_v41  ;;  %v3256_v40 = vld [vmem:[%s4033_s26 + $0x198] sm:$0xff]  ;;  %v3255_v41 = vld [vmem:[%s4033_s26 + $0x190] sm:$0xff] }
 0x170   : > { %3549 = vmatprep.subr.mxu0 %v3908_v8  ;;  %3578 = vmatprep.subr.mxu1 %v3908_v8 }
 0x171   : > { %3550 = vmatpush3.msra.mxu0 %v3189_v42  ;;  %3579 = vmatpush3.msra.mxu1 %v3204_v43  ;;  %v3254_v42 = vld [vmem:[%s4033_s26 + $0x188] sm:$0xff]  ;;  %v3210_v43 = vld [vmem:[%s4043_s22 + $0x1] ss:$0 sm:$0xff] }
 0x172   : > { %3551 = vmatprep.subr.mxu0 %v3908_v8  ;;  %3580 = vmatprep.subr.mxu1 %v3908_v8 }
 0x173   : > { %3552 = vmatpush3.msra.mxu0 %v3188_v44  ;;  %3581 = vmatpush3.msra.mxu1 %v3203_v45  ;;  %v3253_v44 = vld [vmem:[%s4033_s26 + $0x180] sm:$0xff] }
 0x174   : > { %3553 = vmatprep.subr.mxu0 %v3908_v8  ;;  %3582 = vmatprep.subr.mxu1 %v3908_v8  ;;  %v3221_v45 = vld [vmem:[%s4043_s22 + $0x5] ss:$0 sm:$0xff] }
 0x175   : > { %3554 = vmatpush3.msra.mxu0 %v3187_v46  ;;  %3583 = vmatpush3.msra.mxu1 %v3202_v47 }
 0x176   : > { %3555 = vmatprep.subr.mxu0 %v3908_v8  ;;  %3584 = vmatprep.subr.mxu1 %v3908_v8 }
 0x177   : > { %3556 = vmatpush3.msra.mxu0 %v3186_v48  ;;  %3557 = vmatprep.mubr.msk.f32.mxu0 %vm3909_vm2, %v3908_v8 }
 0x178   : > { %3585 = vmatpush3.msra.mxu1 %v3201_v49  ;;  %3586 = vmatprep.mubr.msk.f32.mxu1 %vm3909_vm2, %v3908_v8  ;;  %v3232_v49 = vld [vmem:[%s4043_s22 + $0x9] ss:$0 sm:$0xff] }
 0x179   : > { %3558 = vmatmul.mubr.msk.f32.vlgmr.msra.gmra.mxu0 %vm700_vm3, %v4142_v33  ;;  %3587 = vmatmul.mubr.msk.f32.vlgmr.msra.gmra.mxu1 %vm700_vm3, %v4142_v33 }
 0x17a   : > { %3608 = vmatprep.subr.mxu1 %v3908_v8  ;;  %3624 = vmatprep.mubr.msk.f32.mxu1 %vm3909_vm2, %v3908_v8 }
 0x17b   : > { %3609 = vmatpush3.msra.mxu1 %v3230_v50  ;;  %3560 = vmatprep.subr.mxu0 %v3908_v8 }
 0x17c   : > { %3610 = vmatprep.subr.mxu1 %v3908_v8  ;;  %3562 = vmatprep.mubr.msk.f32.mxu0 %vm3909_vm2, %v3908_v8 }
 0x17d   : > { %3611 = vmatpush3.msra.mxu1 %v3229_v51 }
 0x17e   : > { %3612 = vmatprep.subr.mxu1 %v3908_v8 }
 0x17f   : > { %3613 = vmatpush3.msra.mxu1 %v3228_v52 }
 0x180   : > { %3614 = vmatprep.subr.mxu1 %v3908_v8 }
 0x181   : > { %3615 = vmatpush3.msra.mxu1 %v3227_v53 }
 0x182   : > { %3616 = vmatprep.subr.mxu1 %v3908_v8 }
 0x183   : > { %3617 = vmatpush3.msra.mxu1 %v3226_v54 }
 0x184   : > { %3618 = vmatprep.subr.mxu1 %v3908_v8 }
 0x185   : > { %3619 = vmatpush3.msra.mxu1 %v3225_v55  ;;  %v3262_v55 = vld [vmem:[%s4043_s22 + $0x6] ss:$0 sm:$0xff] }
 0x186   : > { %3620 = vmatprep.subr.mxu1 %v3908_v8 }
 0x187   : > { %3621 = vmatpush3.msra.mxu1 %v3224_v56 }
 0x188   : > { %3622 = vmatprep.subr.mxu1 %v3908_v8 }
 0x189   : > { %3623 = vmatpush3.msra.mxu1 %v3223_v57 }
 0x18a   : > { %3625 = vmatmul.mubr.msk.f32.vlgmr.msra.gmra.mxu1 %vm700_vm3, %v4142_v33  ;;  %3644 = vmatprep.subr.mxu1 %v3908_v8 }
 0x18b   : > { %3648 = vmatprep.mubr.msk.f32.mxu1 %vm3909_vm2, %v3908_v8  ;;  %3645 = vmatpush3.msra.mxu1 %v1117_v20  ;;  %v3270_v20 = vld [vmem:[%s4033_s26 + $0x2b0] sm:$0xff] }
 0x18c   : > { %3646 = vmatprep.subr.mxu1 %v3908_v8 }
 0x18d   : > { %3647 = vmatpush3.msra.mxu1 %v1116_v21  ;;  %v3269_v21 = vld [vmem:[%s4033_s26 + $0x2a8] sm:$0xff] }
 0x18e   : > { %3670 = vmatprep.subr.mxu1 %v3908_v8 }
 0x228   : > { %v770_v60 = vpop.f32.mrf.mxu0  ;;  %v858_v61 = vpop.f32.mrf.mxu1 }
 0x229   : > { %v771_v62 = vadd.f32 %v3173_v58, %v770_v60  ;;  %v859_v63 = vadd.f32 %v3184_v59, %v858_v61 }
 0x22a   : > { %v3521_v0 = vpop.f32.mrf.mxu0  ;;  %v3540_v1 = vpop.f32.mrf.mxu1 }
 0x22b   : > { %v774_v2 = vmul.f32 0.25, %v771_v62  ;;  %3561 = vmatpush3.xpose.msk.msra.mxu0 %vm949_vm4, %v859_v63 }
 0x22c   : > { %3565 = vmatprep.subr.mxu0 %v3908_v8 }
 0x22e   : > { %3563 = vmatmul.mubr.msk.f32.vlgmr.msra.gmra.mxu0 %vm949_vm4, %v774_v2 }
 0x22f   : > { %3567 = vmatprep.mubr.msk.f32.mxu0 %vm3909_vm2, %v3908_v8 }
 0x239   : > { %v945_v4 = vpop.f32.mrf.mxu0  ;;  %v4220_v5 = vpop.f32.mrf.mxu1 }
 0x23a   : > { %v946_v6 = vadd.f32 %v3195_v3, %v945_v4  ;;  %v1202_v46 = vadd.f32 %v3210_v43, %v4220_v5  ;;  %v3273_v43 = vld [vmem:[%s4043_s22 + $0xa] ss:$0 sm:$0xff] }
 0x23b   : > { %v3559_v7 = vpop.f32.mrf.mxu0  ;;  %v3588_v9 = vpop.f32.mrf.mxu1 }
 0x23c   : > { %3566 = vmatpush3.msk.msra.mxu0 %vm1042_vm5, %v946_v6  ;;  %v1205_v51 = vmul.f32 0.25, %v1202_v46  ;;  %v3239_v6 = vld [vmem:[%s4038_s0 + $0x18] sm:$0xff]  ;;  %v3238_v7 = vld [vmem:[%s4038_s0 + $0x10] sm:$0xff] }
 0x23d   : > { %3589 = vmatprep.subr.mxu0 %v3908_v8  ;;  %v3249_v9 = vld [vmem:[%s4033_s26 + $0xb8] sm:$0xff] }
 0x24a   : > { %v4224_v10 = vpop.f32.mrf.mxu1 }
 0x24b   : > { %v1377_v52 = vadd.f32 %v3232_v49, %v4224_v10 }
 0x24c   : > { %v3626_v11 = vpop.f32.mrf.mxu1 }
 0x24d   : > { %v3248_v11 = vld [vmem:[%s4033_s26 + $0xb0] sm:$0xff] }
 0x2ee   : > { %v1022_v12 = vpop.f32.mrf.mxu0 }
 0x2ef   : > { %v1027_v13 = vsel %vm1026_vm6, %v1022_v12, -inf }
 0x2f0   : > { %1028 = vmax.xlane.f32.xlu1 %v1027_v13  ;;  %v3564_v14 = vpop.f32.mrf.mxu0  ;;  %v3247_v13 = vld [vmem:[%s4033_s26 + $0xa8] sm:$0xff] }
 0x2f1   : > { %v3246_v14 = vld [vmem:[%s4033_s26 + $0xa0] sm:$0xff] }
 0x379   : > { %v1029_v15 = vpop.xlane.xlu1 %1028 }
 0x37a   : > { %v1030_v16 = vsub.f32 %v1022_v12, %v1029_v15  ;;  %v3245_v15 = vld [vmem:[%s4033_s26 + $0x98] sm:$0xff] }
 0x37c   : > { %v1031_v17 = vmul.f32 1.442695, %v1030_v16  ;;  %v3244_v16 = vld [vmem:[%s4033_s26 + $0x90] sm:$0xff] }
 0x37e   : > { %3845 = vpow2.f32 %v1031_v17  ;;  %v3243_v17 = vld [vmem:[%s4033_s26 + $0x88] sm:$0xff] }
 0x38b   : > { %v3846_v18 = vpop.eup %3845 }
 0x38c   : > { %v1033_v19 = vsel %vm1026_vm6, %v3846_v18, 0.0 }
 0x38d   : > { %1034 = vadd.xlane.f32.xlu1 %v1033_v19  ;;  %v3271_v19 = vld [vmem:[%s4033_s26 + $0x2b8] sm:$0xff] }
 0x416   : > { %v1035_v22 = vpop.xlane.xlu1 %1034 }
 0x417   : > { %3847 = vrcp.f32 %v1035_v22  ;;  %v3268_v22 = vld [vmem:[%s4033_s26 + $0x2a0] sm:$0xff] }
 0x424   : > { %v3848_v23 = vpop.eup %3847 }
 0x425   : > { %v1037_v24 = vmul.f32 %v3848_v23, %v3846_v18  ;;  %v3242_v18 = vld [vmem:[%s4033_s26 + $0x80] sm:$0xff]  ;;  %v3267_v23 = vld [vmem:[%s4033_s26 + $0x298] sm:$0xff] }
 0x427   : > { %3568 = vmatmul.mubr.msk.f32.vlgmr.msra.gmra.mxu0 %vm1038_vm7, %v1037_v24  ;;  %v3266_v24 = vld [vmem:[%s4033_s26 + $0x290] sm:$0xff] }
 0x428   : > { %3590 = vmatpush3.msra.mxu0 %v3219_v25  ;;  %3605 = vmatprep.mubr.msk.f32.mxu0 %vm3909_vm2, %v3908_v8  ;;  %v3265_v25 = vld [vmem:[%s4033_s26 + $0x288] sm:$0xff] }
 0x429   : > { %3591 = vmatprep.subr.mxu0 %v3908_v8 }
 0x42a   : > { %3592 = vmatpush3.msra.mxu0 %v3218_v26  ;;  %v3264_v26 = vld [vmem:[%s4033_s26 + $0x280] sm:$0xff] }
 0x42b   : > { %3593 = vmatprep.subr.mxu0 %v3908_v8 }
 0x42c   : > { %3594 = vmatpush3.msra.mxu0 %v3217_v27  ;;  %v3300_v27 = vld [vmem:[%s4033_s26 + $0x1f8] sm:$0xff] }
 0x42d   : > { %3595 = vmatprep.subr.mxu0 %v3908_v8 }
 0x42e   : > { %3596 = vmatpush3.msra.mxu0 %v3216_v28  ;;  %v3299_v28 = vld [vmem:[%s4033_s26 + $0x1f0] sm:$0xff] }
 0x42f   : > { %3597 = vmatprep.subr.mxu0 %v3908_v8 }
 0x430   : > { %3598 = vmatpush3.msra.mxu0 %v3215_v29  ;;  %v3298_v29 = vld [vmem:[%s4033_s26 + $0x1e8] sm:$0xff] }
 0x431   : > { %3599 = vmatprep.subr.mxu0 %v3908_v8 }
 0x432   : > { %3600 = vmatpush3.msra.mxu0 %v3214_v30  ;;  %v3297_v30 = vld [vmem:[%s4033_s26 + $0x1e0] sm:$0xff] }
 0x433   : > { %3601 = vmatprep.subr.mxu0 %v3908_v8 }
 0x434   : > { %3602 = vmatpush3.msra.mxu0 %v3213_v31  ;;  %v3296_v31 = vld [vmem:[%s4033_s26 + $0x1d8] sm:$0xff] }
 0x435   : > { %3603 = vmatprep.subr.mxu0 %v3908_v8 }
 0x436   : > { %3604 = vmatpush3.msra.mxu0 %v3212_v32  ;;  %v3295_v32 = vld [vmem:[%s4033_s26 + $0x1d0] sm:$0xff] }
 0x437   : > { %3606 = vmatmul.mubr.msk.f32.vlgmr.msra.gmra.mxu0 %vm700_vm3, %v4142_v33  ;;  %3627 = vmatprep.subr.mxu0 %v3908_v8 }
 0x438   : > { %3629 = vmatprep.mubr.msk.f32.mxu0 %vm3909_vm2, %v3908_v8 }
 0x4e7   : > { %v1112_v35 = vpop.f32.mrf.mxu0 }
 0x4e8   : > { %3649 = vmatmul.mubr.msk.f32.vlgmr.msra.gmra.mxu1 %vm949_vm4, %v1112_v35  ;;  %v3293_v35 = vld [vmem:[%s4033_s26 + $0x1c0] sm:$0xff] }
 0x4e9   : > { %3671 = vmatpush3.msra.mxu1 %v3260_v34  ;;  %v3569_v37 = vpop.f32.mrf.mxu0  ;;  %3686 = vmatprep.mubr.msk.f32.mxu1 %vm3909_vm2, %v3908_v8  ;;  %v3294_v34 = vld [vmem:[%s4033_s26 + $0x1c8] sm:$0xff] }
 0x4ea   : > { %3672 = vmatprep.subr.mxu1 %v3908_v8 }
 0x4eb   : > { %3673 = vmatpush3.msra.mxu1 %v3259_v36 }
 0x4ec   : > { %3674 = vmatprep.subr.mxu1 %v3908_v8 }
 0x4ed   : > { %3675 = vmatpush3.msra.mxu1 %v3258_v38  ;;  %v3251_v38 = vld [vmem:[%s4043_s22 + $0x2] ss:$0 sm:$0xff] }
 0x4ee   : > { %3676 = vmatprep.subr.mxu1 %v3908_v8 }
 0x4ef   : > { %3677 = vmatpush3.msra.mxu1 %v3257_v39 }
 0x4f0   : > { %3678 = vmatprep.subr.mxu1 %v3908_v8 }
 0x4f1   : > { %3679 = vmatpush3.msra.mxu1 %v3256_v40 }
 0x4f2   : > { %3680 = vmatprep.subr.mxu1 %v3908_v8 }
 0x4f3   : > { %3681 = vmatpush3.msra.mxu1 %v3255_v41 }
 0x4f4   : > { %3682 = vmatprep.subr.mxu1 %v3908_v8 }
 0x4f5   : > { %3683 = vmatpush3.msra.mxu1 %v3254_v42 }
 0x4f6   : > { %3684 = vmatprep.subr.mxu1 %v3908_v8 }
 0x4f7   : > { %v1289_v47 = vpop.f32.mrf.mxu0  ;;  %3685 = vmatpush3.msra.mxu1 %v3253_v44 }
 0x4f8   : > { %v1290_v48 = vadd.f32 %v3221_v45, %v1289_v47  ;;  %3687 = vmatmul.mubr.msk.f32.vlgmr.msra.gmra.mxu1 %vm700_vm3, %v4142_v33  ;;  %3708 = vmatprep.subr.mxu1 %v3908_v8  ;;  %v3302_v47 = vld [vmem:[%s4043_s22 + $0x7] ss:$0 sm:$0xff] }
 0x4f9   : > { %v3607_v50 = vpop.f32.mrf.mxu0  ;;  %3710 = vmatprep.mubr.msk.f32.mxu1 %vm3909_vm2, %v3908_v8 }
 0x4fa   : > { %3628 = vmatpush3.xpose.msk.msra.mxu0 %vm949_vm4, %v1290_v48 }
 0x4fb   : > { %3632 = vmatprep.subr.mxu0 %v3908_v8 }
 0x4fd   : > { %3630 = vmatmul.mubr.msk.f32.vlgmr.msra.gmra.mxu0 %vm949_vm4, %v1205_v51 }
 0x4fe   : > { %3633 = vmatpush3.msk.msra.mxu0 %vm1042_vm5, %v1377_v52  ;;  %3634 = vmatprep.mubr.msk.f32.mxu0 %vm3909_vm2, %v3908_v8 }
 0x4ff   : > { %3637 = vmatprep.subr.mxu0 %v3908_v8 }
 0x5a8   : > { %v4290_v53 = vpop.f32.mrf.mxu1 }
 0x5aa   : > { %v3650_v54 = vpop.f32.mrf.mxu1 }
 0x5b8   : > { %v1863_v56 = vpop.f32.mrf.mxu1 }
 0x5b9   : > { %v1864_v57 = vadd.f32 %v3262_v55, %v1863_v56 }
 0x5ba   : > { %v3688_v58 = vpop.f32.mrf.mxu1 }
 0x5bb   : > { %3709 = vmatpush3.xpose.msk.msra.mxu1 %vm949_vm4, %v1864_v57 }
 0x5bc   : > { %3713 = vmatprep.subr.mxu1 %v3908_v8 }
 0x5bd   : > { %v1452_v59 = vpop.f32.mrf.mxu0 }
 0x5be   : > { %v1456_v60 = vsel %vm1026_vm6, %v1452_v59, -inf }
 0x5bf   : > { %1457 = vmax.xlane.f32.xlu0 %v1456_v60  ;;  %v3631_v61 = vpop.f32.mrf.mxu0 }
 0x648   : > { %v1458_v62 = vpop.xlane.xlu0 %1457 }
 0x649   : > { %v1459_v63 = vsub.f32 %v1452_v59, %v1458_v62 }
 0x64b   : > { %v1460_v0 = vmul.f32 1.442695, %v1459_v63  ;;  %v3280_v63 = vld [vmem:[%s4038_s0 + $0x28] sm:$0xff] }
 0x64d   : > { %3849 = vpow2.f32 %v1460_v0  ;;  %v3279_v0 = vld [vmem:[%s4038_s0 + $0x20] sm:$0xff] }
 0x65a   : > { %v3850_v1 = vpop.eup %3849 }
 0x65b   : > { %v1462_v2 = vsel %vm1026_vm6, %v3850_v1, 0.0 }
 0x65c   : > { %1463 = vadd.xlane.f32.xlu1 %v1462_v2 }
 0x6e5   : > { %v1464_v3 = vpop.xlane.xlu1 %1463 }
 0x6e6   : > { %3851 = vrcp.f32 %v1464_v3  ;;  %v3288_v3 = vld [vmem:[%s4033_s26 + $0xf0] sm:$0xff] }
 0x6f3   : > { %v3852_v4 = vpop.eup %3851 }
 0x6f4   : > { %v1466_v5 = vmul.f32 %v3852_v4, %v3850_v1  ;;  %v3289_v1 = vld [vmem:[%s4033_s26 + $0xf8] sm:$0xff] }
 0x6f6   : > { %3635 = vmatmul.mubr.msk.f32.vlgmr.msra.gmra.mxu0 %vm1038_vm7, %v1466_v5  ;;  %v3287_v5 = vld [vmem:[%s4033_s26 + $0xe8] sm:$0xff] }
 0x6f7   : > { %3638 = vmatpush3.msra.mxu0 %v3239_v6  ;;  %3641 = vmatprep.mubr.msk.f32.mxu0 %vm3909_vm2, %v3908_v8  ;;  %v3286_v6 = vld [vmem:[%s4033_s26 + $0xe0] sm:$0xff] }
 0x6f8   : > { %3639 = vmatprep.subr.mxu0 %v3908_v8 }
 0x6f9   : > { %3640 = vmatpush3.msra.mxu0 %v3238_v7  ;;  %v3285_v7 = vld [vmem:[%s4033_s26 + $0xd8] sm:$0xff] }
 0x6fa   : > { %3651 = vmatprep.subr.mxu0 %v3908_v8 }
 0x7b6   : > { %v1539_v10 = vpop.f32.mrf.mxu0 }
 0x7b7   : > { %3642 = vmatmul.mubr.msk.f32.vlgmr.msra.gmra.mxu0 %vm949_vm4, %v1539_v10  ;;  %v3283_v10 = vld [vmem:[%s4033_s26 + $0xc8] sm:$0xff] }
 0x7b8   : > { %3652 = vmatpush3.msra.mxu0 %v3249_v9  ;;  %v3636_v12 = vpop.f32.mrf.mxu0  ;;  %3667 = vmatprep.mubr.msk.f32.mxu0 %vm3909_vm2, %v3908_v8  ;;  %v3284_v9 = vld [vmem:[%s4033_s26 + $0xd0] sm:$0xff] }
 0x7b9   : > { %3653 = vmatprep.subr.mxu0 %v3908_v8  ;;  %v3311_v12 = vld [vmem:[%s4033_s26 + $0x2f8] sm:$0xff] }
 0x7ba   : > { %3654 = vmatpush3.msra.mxu0 %v3248_v11  ;;  %v3282_v11 = vld [vmem:[%s4033_s26 + $0xc0] sm:$0xff] }
 0x7bb   : > { %3655 = vmatprep.subr.mxu0 %v3908_v8 }
 0x7bc   : > { %3656 = vmatpush3.msra.mxu0 %v3247_v13  ;;  %v3310_v13 = vld [vmem:[%s4033_s26 + $0x2f0] sm:$0xff] }
 0x7bd   : > { %3657 = vmatprep.subr.mxu0 %v3908_v8 }
 0x7be   : > { %3658 = vmatpush3.msra.mxu0 %v3246_v14  ;;  %v3309_v14 = vld [vmem:[%s4033_s26 + $0x2e8] sm:$0xff] }
 0x7bf   : > { %3659 = vmatprep.subr.mxu0 %v3908_v8 }
 0x7c0   : > { %3660 = vmatpush3.msra.mxu0 %v3245_v15  ;;  %v3308_v15 = vld [vmem:[%s4033_s26 + $0x2e0] sm:$0xff] }
 0x7c1   : > { %3661 = vmatprep.subr.mxu0 %v3908_v8 }
 0x7c2   : > { %3662 = vmatpush3.msra.mxu0 %v3244_v16  ;;  %v3307_v16 = vld [vmem:[%s4033_s26 + $0x2d8] sm:$0xff] }
 0x7c3   : > { %3663 = vmatprep.subr.mxu0 %v3908_v8 }
 0x7c4   : > { %3664 = vmatpush3.msra.mxu0 %v3243_v17  ;;  %v3306_v17 = vld [vmem:[%s4033_s26 + $0x2d0] sm:$0xff] }
 0x7c5   : > { %3665 = vmatprep.subr.mxu0 %v3908_v8 }
 0x7c6   : > { %3666 = vmatpush3.msra.mxu0 %v3242_v18  ;;  %v3305_v18 = vld [vmem:[%s4033_s26 + $0x2c8] sm:$0xff] }
 0x7c7   : > { %3668 = vmatmul.mubr.msk.f32.vlgmr.msra.gmra.mxu0 %vm700_vm3, %v4142_v33  ;;  %3689 = vmatprep.subr.mxu0 %v3908_v8 }
 0x7c8   : > { %3690 = vmatpush3.msra.mxu0 %v3271_v19  ;;  %3705 = vmatprep.mubr.msk.f32.mxu0 %vm3909_vm2, %v3908_v8  ;;  %v3304_v19 = vld [vmem:[%s4033_s26 + $0x2c0] sm:$0xff] }
 0x7c9   : > { %3691 = vmatprep.subr.mxu0 %v3908_v8 }
 0x7ca   : > { %3692 = vmatpush3.msra.mxu0 %v3270_v20 }
 0x7cb   : > { %3693 = vmatprep.subr.mxu0 %v3908_v8 }
 0x7cc   : > { %3694 = vmatpush3.msra.mxu0 %v3269_v21 }
 0x7cd   : > { %3695 = vmatprep.subr.mxu0 %v3908_v8 }
 0x7ce   : > { %3696 = vmatpush3.msra.mxu0 %v3268_v22 }
 0x7cf   : > { %3697 = vmatprep.subr.mxu0 %v3908_v8 }
 0x7d0   : > { %3698 = vmatpush3.msra.mxu0 %v3267_v23 }
 0x7d1   : > { %3699 = vmatprep.subr.mxu0 %v3908_v8 }
 0x7d2   : > { %3700 = vmatpush3.msra.mxu0 %v3266_v24  ;;  %v3291_v24 = vld [vmem:[%s4043_s22 + $0x3] ss:$0 sm:$0xff] }
 0x7d3   : > { %3701 = vmatprep.subr.mxu0 %v3908_v8 }
 0x7d4   : > { %3702 = vmatpush3.msra.mxu0 %v3265_v25 }
 0x7d5   : > { %3703 = vmatprep.subr.mxu0 %v3908_v8 }
 0x7d6   : > { %3704 = vmatpush3.msra.mxu0 %v3264_v26 }
 0x7d7   : > { %3706 = vmatmul.mubr.msk.f32.vlgmr.msra.gmra.mxu0 %vm700_vm3, %v4142_v33  ;;  %3744 = vmatprep.subr.mxu0 %v3908_v8 }
 0x7d8   : > { %3745 = vmatpush3.msra.mxu0 %v3300_v27  ;;  %3760 = vmatprep.mubr.msk.f32.mxu0 %vm3909_vm2, %v3908_v8 }
 0x7d9   : > { %3746 = vmatprep.subr.mxu0 %v3908_v8 }
 0x7da   : > { %3747 = vmatpush3.msra.mxu0 %v3299_v28 }
 0x7db   : > { %3748 = vmatprep.subr.mxu0 %v3908_v8 }
 0x7dc   : > { %3749 = vmatpush3.msra.mxu0 %v3298_v29  ;;  %v3313_v29 = vld [vmem:[%s4043_s22 + $0xb] ss:$0 sm:$0xff] }
 0x7dd   : > { %3750 = vmatprep.subr.mxu0 %v3908_v8 }
 0x7de   : > { %3751 = vmatpush3.msra.mxu0 %v3297_v30 }
 0x7df   : > { %3752 = vmatprep.subr.mxu0 %v3908_v8 }
 0x7e0   : > { %3753 = vmatpush3.msra.mxu0 %v3296_v31 }
 0x7e1   : > { %3754 = vmatprep.subr.mxu0 %v3908_v8 }
 0x7e2   : > { %3755 = vmatpush3.msra.mxu0 %v3295_v32 }
 0x7e3   : > { %3756 = vmatprep.subr.mxu0 %v3908_v8 }
 0x7e4   : > { %3757 = vmatpush3.msra.mxu0 %v3294_v34 }
 0x7e5   : > { %3758 = vmatprep.subr.mxu0 %v3908_v8 }
 0x7e6   : > { %3759 = vmatpush3.msra.mxu0 %v3293_v35 }
 0x7e7   : > { %3761 = vmatmul.mubr.msk.f32.vlgmr.msra.gmra.mxu0 %vm700_vm3, %v4142_v33  ;;  %3782 = vmatprep.subr.mxu0 %v3908_v8 }
 0x7e8   : > { %3784 = vmatprep.mubr.msk.f32.mxu0 %vm3909_vm2, %v3908_v8 }
 0x877   : > { %v4367_v36 = vpop.f32.mrf.mxu0 }
 0x878   : > { %v1689_v20 = vadd.f32 %v4290_v53, %v4367_v36 }
 0x879   : > { %v3643_v37 = vpop.f32.mrf.mxu0 }
 0x887   : > { %v1775_v39 = vpop.f32.mrf.mxu0 }
 0x888   : > { %v1776_v40 = vadd.f32 %v3251_v38, %v1775_v39 }
 0x889   : > { %v3669_v41 = vpop.f32.mrf.mxu0 }
 0x88a   : > { %v1779_v42 = vmul.f32 0.25, %v1776_v40 }
 0x88c   : > { %3711 = vmatmul.mubr.msk.f32.vlgmr.msra.gmra.mxu1 %vm949_vm4, %v1779_v42 }
 0x88d   : > { %3715 = vmatprep.mubr.msk.f32.mxu1 %vm3909_vm2, %v3908_v8 }
 0x897   : > { %v1950_v44 = vpop.f32.mrf.mxu0 }
 0x898   : > { %v1951_v45 = vadd.f32 %v3273_v43, %v1950_v44  ;;  %v3320_v43 = vld [vmem:[%s4038_s0 + $0x38] sm:$0xff]  ;;  %v3319_v44 = vld [vmem:[%s4038_s0 + $0x30] sm:$0xff] }
 0x899   : > { %v3707_v46 = vpop.f32.mrf.mxu0 }
 0x89a   : > { %3714 = vmatpush3.msk.msra.mxu1 %vm1042_vm5, %v1951_v45 }
 0x89b   : > { %3718 = vmatprep.subr.mxu1 %v3908_v8 }
 0x8a7   : > { %v2365_v48 = vpop.f32.mrf.mxu0 }
 0x8a8   : > { %v2366_v49 = vadd.f32 %v3302_v47, %v2365_v48 }
 0x8a9   : > { %v3762_v50 = vpop.f32.mrf.mxu0 }
 0x8aa   : > { %3783 = vmatpush3.xpose.msk.msra.mxu0 %vm949_vm4, %v2366_v49  ;;  %v3322_v49 = vld [vmem:[%s4583_s28] ss:$0 sm:$0xff] }
 0x8ab   : > { %3787 = vmatprep.subr.mxu0 %v3908_v8 }
 0x94c   : > { %v2026_v51 = vpop.f32.mrf.mxu1 }
 0x94d   : > { %v2030_v52 = vsel %vm1026_vm6, %v2026_v51, -inf }
 0x94e   : > { %2031 = vmax.xlane.f32.xlu0 %v2030_v52  ;;  %v3712_v54 = vpop.f32.mrf.mxu1 }
 0x9d7   : > { %v2032_v55 = vpop.xlane.xlu0 %2031 }
 0x9d8   : > { %v2033_v56 = vsub.f32 %v2026_v51, %v2032_v55  ;;  %v3867_v51 = vld [vmem:[%s4082_s5] sm:$0x1f] }
 0x9da   : > { %v2034_v57 = vmul.f32 1.442695, %v2033_v56 }
 0x9dc   : > { %3853 = vpow2.f32 %v2034_v57 }
 0x9e9   : > { %v3854_v58 = vpop.eup %3853 }
 0x9ea   : > { %v2036_v59 = vsel %vm1026_vm6, %v3854_v58, 0.0 }
 0x9eb   : > { %2037 = vadd.xlane.f32.xlu1 %v2036_v59 }
 0xa74   : > { %v2038_v60 = vpop.xlane.xlu1 %2037 }
 0xa75   : > { %3855 = vrcp.f32 %v2038_v60  ;;  %v2749_v60 = vld [vmem:[%s4062_s20 + $0x78] sm:$0xff] }
 0xa82   : > { %v3856_v61 = vpop.eup %3855 }
 0xa83   : > { %v2040_v62 = vmul.f32 %v3856_v61, %v3854_v58  ;;  %v2748_v61 = vld [vmem:[%s4062_s20 + $0x70] sm:$0xff] }
 0xa85   : > { %3716 = vmatmul.mubr.msk.f32.vlgmr.msra.gmra.mxu1 %vm1038_vm7, %v2040_v62  ;;  %v2747_v62 = vld [vmem:[%s4062_s20 + $0x68] sm:$0xff] }
 0xa86   : > { %3719 = vmatpush3.msra.mxu1 %v3280_v63  ;;  %3722 = vmatprep.mubr.msk.f32.mxu1 %vm3909_vm2, %v3908_v8  ;;  %v2746_v63 = vld [vmem:[%s4062_s20 + $0x60] sm:$0xff] }
 0xa87   : > { %3720 = vmatprep.subr.mxu1 %v3908_v8 }
 0xa88   : > { %3721 = vmatpush3.msra.mxu1 %v3279_v0  ;;  %v2745_v0 = vld [vmem:[%s4062_s20 + $0x58] sm:$0xff] }
 0xa89   : > { %3725 = vmatprep.subr.mxu1 %v3908_v8 }
 0xb45   : > { %v2113_v2 = vpop.f32.mrf.mxu1 }
 0xb46   : > { %3723 = vmatmul.mubr.msk.f32.vlgmr.msra.gmra.mxu1 %vm949_vm4, %v2113_v2  ;;  %v2743_v2 = vld [vmem:[%s4062_s20 + $0x48] sm:$0xff] }
 0xb47   : > { %3726 = vmatpush3.msra.mxu1 %v3289_v1  ;;  %v3717_v4 = vpop.f32.mrf.mxu1  ;;  %3741 = vmatprep.mubr.msk.f32.mxu1 %vm3909_vm2, %v3908_v8  ;;  %v2744_v1 = vld [vmem:[%s4062_s20 + $0x50] sm:$0xff] }
 0xb48   : > { %3727 = vmatprep.subr.mxu1 %v3908_v8  ;;  %v2741_v4 = vld [vmem:[%s4062_s20 + $0x38] sm:$0xff] }
 0xb49   : > { %3728 = vmatpush3.msra.mxu1 %v3288_v3  ;;  %v2742_v3 = vld [vmem:[%s4062_s20 + $0x40] sm:$0xff] }
 0xb4a   : > { %3729 = vmatprep.subr.mxu1 %v3908_v8 }
 0xb4b   : > { %3730 = vmatpush3.msra.mxu1 %v3287_v5  ;;  %v2740_v5 = vld [vmem:[%s4062_s20 + $0x30] sm:$0xff] }
 0xb4c   : > { %3731 = vmatprep.subr.mxu1 %v3908_v8 }
 0xb4d   : > { %3732 = vmatpush3.msra.mxu1 %v3286_v6  ;;  %v2739_v6 = vld [vmem:[%s4062_s20 + $0x28] sm:$0xff] }
 0xb4e   : > { %3733 = vmatprep.subr.mxu1 %v3908_v8 }
 0xb4f   : > { %3734 = vmatpush3.msra.mxu1 %v3285_v7  ;;  %v2738_v7 = vld [vmem:[%s4062_s20 + $0x20] sm:$0xff] }
 0xb50   : > { %3735 = vmatprep.subr.mxu1 %v3908_v8 }
 0xb51   : > { %3736 = vmatpush3.msra.mxu1 %v3284_v9  ;;  %v2737_v9 = vld [vmem:[%s4062_s20 + $0x18] sm:$0xff] }
 0xb52   : > { %3737 = vmatprep.subr.mxu1 %v3908_v8 }
 0xb53   : > { %3738 = vmatpush3.msra.mxu1 %v3283_v10  ;;  %v2736_v10 = vld [vmem:[%s4062_s20 + $0x10] sm:$0xff] }
 0xb54   : > { %3739 = vmatprep.subr.mxu1 %v3908_v8 }
 0xb55   : > { %3740 = vmatpush3.msra.mxu1 %v3282_v11  ;;  %v2735_v11 = vld [vmem:[%s4062_s20 + $0x8] sm:$0xff] }
 0xb56   : > { %3742 = vmatmul.mubr.msk.f32.vlgmr.msra.gmra.mxu1 %vm700_vm3, %v4142_v33  ;;  %3763 = vmatprep.subr.mxu1 %v3908_v8 }
 0xb57   : > { %3764 = vmatpush3.msra.mxu1 %v3311_v12  ;;  %3779 = vmatprep.mubr.msk.f32.mxu1 %vm3909_vm2, %v3908_v8  ;;  %v2734_v12 = vld [vmem:[%s4062_s20] sm:$0xff] }
 0xb58   : > { %3765 = vmatprep.subr.mxu1 %v3908_v8 }
 0xb59   : > { %3766 = vmatpush3.msra.mxu1 %v3310_v13 }
 0xb5a   : > { %3767 = vmatprep.subr.mxu1 %v3908_v8 }
 0xb5b   : > { %3768 = vmatpush3.msra.mxu1 %v3309_v14 }
 0xb5c   : > { %3769 = vmatprep.subr.mxu1 %v3908_v8 }
 0xb5d   : > { %3770 = vmatpush3.msra.mxu1 %v3308_v15 }
 0xb5e   : > { %3771 = vmatprep.subr.mxu1 %v3908_v8 }
 0xb5f   : > { %3772 = vmatpush3.msra.mxu1 %v3307_v16 }
 0xb60   : > { %3773 = vmatprep.subr.mxu1 %v3908_v8 }
 0xb61   : > { %3774 = vmatpush3.msra.mxu1 %v3306_v17  ;;  %v3323_v17 = vld [vmem:[%s4584_s24] ss:$0 sm:$0xff] }
 0xb62   : > { %3775 = vmatprep.subr.mxu1 %v3908_v8 }
 0xb63   : > { %3776 = vmatpush3.msra.mxu1 %v3305_v18 }
 0xb64   : > { %3777 = vmatprep.subr.mxu1 %v3908_v8 }
 0xb65   : > { %3778 = vmatpush3.msra.mxu1 %v3304_v19  ;;  %v3324_v19 = vld [vmem:[%s4585_s29] ss:$0 sm:$0xff] }
 0xb66   : > { %3780 = vmatmul.mubr.msk.f32.vlgmr.msra.gmra.mxu1 %vm700_vm3, %v4142_v33 }
 0xc06   : > { %v2189_v21 = vpop.f32.mrf.mxu1 }
 0xc07   : > { %v2193_v22 = vadd.f32 %v2189_v21, %v1689_v20 }
 0xc08   : > { %v3724_v23 = vpop.f32.mrf.mxu1 }
 0xc09   : > { %v2869_v23 = vld [vmem:[%s4077_s30 + $0x78] sm:$0xff] }
 0xc16   : > { %v2277_v25 = vpop.f32.mrf.mxu1 }
 0xc17   : > { %v2278_v26 = vadd.f32 %v3291_v24, %v2277_v25  ;;  %v2884_v24 = vld [vmem:[%s4077_s30 + $0xf0] sm:$0xff] }
 0xc18   : > { %v3743_v27 = vpop.f32.mrf.mxu1  ;;  %v2868_v25 = vld [vmem:[%s4077_s30 + $0x70] sm:$0xff] }
 0xc19   : > { %v2281_v28 = vmul.f32 0.25, %v2278_v26  ;;  %v2883_v26 = vld [vmem:[%s4077_s30 + $0xe8] sm:$0xff] }
 0xc1a   : > { %v2867_v27 = vld [vmem:[%s4077_s30 + $0x68] sm:$0xff] }
 0xc1b   : > { %3785 = vmatmul.mubr.msk.f32.vlgmr.msra.gmra.mxu0 %vm949_vm4, %v2281_v28  ;;  %v2882_v28 = vld [vmem:[%s4077_s30 + $0xe0] sm:$0xff] }
 0xc1c   : > { %3789 = vmatprep.mubr.msk.f32.mxu0 %vm3909_vm2, %v3908_v8 }
 0xc26   : > { %v2452_v30 = vpop.f32.mrf.mxu1 }
 0xc27   : > { %v2453_v31 = vadd.f32 %v3313_v29, %v2452_v30  ;;  %v2866_v29 = vld [vmem:[%s4077_s30 + $0x60] sm:$0xff]  ;;  %v2881_v30 = vld [vmem:[%s4077_s30 + $0xd8] sm:$0xff] }
 0xc28   : > { %v3781_v33 = vpop.f32.mrf.mxu1 }
 0xc29   : > { %3788 = vmatpush3.msk.msra.mxu0 %vm1042_vm5, %v2453_v31  ;;  %v2865_v31 = vld [vmem:[%s4077_s30 + $0x58] sm:$0xff]  ;;  %v2880_v33 = vld [vmem:[%s4077_s30 + $0xd0] sm:$0xff] }
 0xc2a   : > { %3792 = vmatprep.subr.mxu0 %v3908_v8 }
 0xcdb   : > { %v2528_v53 = vpop.f32.mrf.mxu0 }
 0xcdc   : > { %v2532_v32 = vsel %vm1026_vm6, %v2528_v53, -inf }
 0xcdd   : > { %2533 = vmax.xlane.f32.xlu0 %v2532_v32  ;;  %v3786_v34 = vpop.f32.mrf.mxu0  ;;  %v2879_v32 = vld [vmem:[%s4077_s30 + $0xc8] sm:$0xff] }
 0xcde   : > { %v2863_v34 = vld [vmem:[%s4077_s30 + $0x48] sm:$0xff] }
 0xd66   : > { %v2534_v35 = vpop.xlane.xlu0 %2533 }
 0xd67   : > { %v2535_v36 = vsub.f32 %v2528_v53, %v2534_v35  ;;  %v2864_v53 = vld [vmem:[%s4077_s30 + $0x50] sm:$0xff]  ;;  %v2878_v35 = vld [vmem:[%s4077_s30 + $0xc0] sm:$0xff] }
 0xd69   : > { %v2536_v37 = vmul.f32 1.442695, %v2535_v36  ;;  %v2862_v36 = vld [vmem:[%s4077_s30 + $0x40] sm:$0xff] }
 0xd6b   : > { %3857 = vpow2.f32 %v2536_v37  ;;  %v2877_v37 = vld [vmem:[%s4077_s30 + $0xb8] sm:$0xff] }
 0xd78   : > { %v3858_v38 = vpop.eup %3857 }
 0xd79   : > { %v2538_v39 = vsel %vm1026_vm6, %v3858_v38, 0.0 }
 0xd7a   : > { %2539 = vadd.xlane.f32.xlu1 %v2538_v39  ;;  %v2876_v39 = vld [vmem:[%s4077_s30 + $0xb0] sm:$0xff] }
 0xe03   : > { %v2540_v40 = vpop.xlane.xlu1 %2539 }
 0xe04   : > { %3859 = vrcp.f32 %v2540_v40  ;;  %v2860_v40 = vld [vmem:[%s4077_s30 + $0x30] sm:$0xff] }
 0xe11   : > { %v3860_v41 = vpop.eup %3859 }
 0xe12   : > { %v2542_v42 = vmul.f32 %v3860_v41, %v3858_v38  ;;  %v2861_v38 = vld [vmem:[%s4077_s30 + $0x38] sm:$0xff]  ;;  %v2875_v41 = vld [vmem:[%s4077_s30 + $0xa8] sm:$0xff] }
 0xe14   : > { %3790 = vmatmul.mubr.msk.f32.vlgmr.msra.gmra.mxu0 %vm1038_vm7, %v2542_v42  ;;  %v2859_v42 = vld [vmem:[%s4077_s30 + $0x28] sm:$0xff] }
 0xe15   : > { %3793 = vmatpush3.msra.mxu0 %v3320_v43  ;;  %3796 = vmatprep.mubr.msk.f32.mxu0 %vm3909_vm2, %v3908_v8  ;;  %v2874_v43 = vld [vmem:[%s4077_s30 + $0xa0] sm:$0xff] }
 0xe16   : > { %3794 = vmatprep.subr.mxu0 %v3908_v8 }
 0xe17   : > { %3795 = vmatpush3.msra.mxu0 %v3319_v44  ;;  %v2858_v44 = vld [vmem:[%s4077_s30 + $0x20] sm:$0xff] }
 0xe18   : > { %2781 = vmatprep.subr.mxu0 %v2749_v60 }
 0xed4   : > { %v2615_v45 = vpop.f32.mrf.mxu0 }
 0xed5   : > { %3797 = vmatmul.mubr.msk.f32.vlgmr.msra.gmra.mxu0 %vm949_vm4, %v2615_v45  ;;  %v2873_v45 = vld [vmem:[%s4077_s30 + $0x98] sm:$0xff] }
 0xed6   : > { %v3791_v46 = vpop.f32.mrf.mxu0  ;;  %2829 = vmatprep.mubr.f32.mxu0 %v3908_v8  ;;  %2782 = vmatpush1.msra.mxu0 %v2748_v61 }
 0xed7   : > { %2783 = vmatprep.subr.mxu0 %v2747_v62  ;;  %v2857_v46 = vld [vmem:[%s4077_s30 + $0x18] sm:$0xff] }
 0xed8   : > { %2784 = vmatpush1.msra.mxu0 %v2746_v63 }
 0xed9   : > { %2785 = vmatprep.subr.mxu0 %v2745_v0 }
 0xeda   : > { %2786 = vmatpush1.msra.mxu0 %v2744_v1 }
 0xedb   : > { %2787 = vmatprep.subr.mxu0 %v2743_v2 }
 0xedc   : > { %2788 = vmatpush1.msra.mxu0 %v2742_v3 }
 0xedd   : > { %2789 = vmatprep.subr.mxu0 %v2741_v4 }
 0xede   : > { %2790 = vmatpush1.msra.mxu0 %v2740_v5 }
 0xedf   : > { %2791 = vmatprep.subr.mxu0 %v2739_v6 }
 0xee0   : > { %2792 = vmatpush1.msra.mxu0 %v2738_v7 }
 0xee1   : > { %2793 = vmatprep.subr.mxu0 %v2737_v9 }
 0xee2   : > { %2794 = vmatpush1.msra.mxu0 %v2736_v10 }
 0xee3   : > { %2795 = vmatprep.subr.mxu0 %v2735_v11 }
 0xee4   : > { %2796 = vmatpush1.msra.mxu0 %v2734_v12 }
 0xf95   : > { %v2691_v47 = vpop.f32.mrf.mxu0 }
 0xf96   : > { %v2695_v48 = vadd.f32 %v2691_v47, %v2193_v22  ;;  %v2885_v22 = vld [vmem:[%s4077_s30 + $0xf8] sm:$0xff]  ;;  %v2872_v47 = vld [vmem:[%s4077_s30 + $0x90] sm:$0xff] }
 0xf97   : > { %v3798_v50 = vpop.f32.mrf.mxu0  ;;  %3468 = vmatprep.subr.mxu1 %v2885_v22 }
 0xf98   : > { %v2696_v52 = vadd.f32 %v3867_v51, %v2695_v48  ;;  %3469 = vmatpush3.msra.mxu1 %v2869_v23  ;;  %v2856_v48 = vld [vmem:[%s4077_s30 + $0x10] sm:$0xff]  ;;  %v2855_v50 = vld [vmem:[%s4077_s30 + $0x8] sm:$0xff]  ;;  %v2870_v51 = vld [vmem:[%s4077_s30 + $0x80] sm:$0xff] }
 0xf99   : > { %3470 = vmatprep.subr.mxu1 %v2884_v24 }
 0xf9a   : > { %v4453_v54 = vadd.f32 %v3322_v49, %v2696_v52  ;;  %3471 = vmatpush3.msra.mxu1 %v2868_v25  ;;  %v2871_v49 = vld [vmem:[%s4077_s30 + $0x88] sm:$0xff]  ;;  %v2854_v52 = vld [vmem:[%s4077_s30] sm:$0xff] }
 0xf9b   : > { %3472 = vmatprep.subr.mxu1 %v2883_v26 }
 0xf9c   : > { %v2707_v55 = vsel %vm656_vm1, %v4453_v54, 0.0  ;;  %3473 = vmatpush3.msra.mxu1 %v2867_v27 }
 0xf9d   : > { %2708 = vadd.xlane.f32.xlu0 %v2707_v55  ;;  %3474 = vmatprep.subr.mxu1 %v2882_v28  ;;  %v2752_v55 = vlaneseq }
 0xf9e   : > { %3475 = vmatpush3.msra.mxu1 %v2866_v29 }
 0xf9f   : > { %3476 = vmatprep.subr.mxu1 %v2881_v30 }
 0xfa0   : > { %3477 = vmatpush3.msra.mxu1 %v2865_v31 }
 0xfa1   : > { %3478 = vmatprep.subr.mxu1 %v2880_v33 }
 0xfa2   : > { %3479 = vmatpush3.msra.mxu1 %v2864_v53 }
 0xfa3   : > { %3480 = vmatprep.subr.mxu1 %v2879_v32 }
 0xfa4   : > { %3481 = vmatpush3.msra.mxu1 %v2863_v34 }
 0xfa5   : > { %3482 = vmatprep.subr.mxu1 %v2878_v35 }
 0xfa6   : > { %3483 = vmatpush3.msra.mxu1 %v2862_v36 }
 0xfa7   : > { %3484 = vmatprep.subr.mxu1 %v2877_v37 }
 0xfa8   : > { %3485 = vmatpush3.msra.mxu1 %v2861_v38 }
 0xfa9   : > { %3486 = vmatprep.subr.mxu1 %v2876_v39 }
 0xfaa   : > { %3487 = vmatpush3.msra.mxu1 %v2860_v40 }
 0xfab   : > { %3488 = vmatprep.subr.mxu1 %v2875_v41 }
 0xfac   : > { %3489 = vmatpush3.msra.mxu1 %v2859_v42 }
 0xfad   : > { %3490 = vmatprep.subr.mxu1 %v2874_v43 }
 0xfae   : > { %3491 = vmatpush3.msra.mxu1 %v2858_v44 }
 0xfaf   : > { %3492 = vmatprep.subr.mxu1 %v2873_v45 }
 0xfb0   : > { %3493 = vmatpush3.msra.mxu1 %v2857_v46 }
 0xfb1   : > { %3494 = vmatprep.subr.mxu1 %v2872_v47 }
 0xfb2   : > { %3495 = vmatpush3.msra.mxu1 %v2856_v48 }
 0xfb3   : > { %3496 = vmatprep.subr.mxu1 %v2871_v49 }
 0xfb4   : > { %3497 = vmatpush3.msra.mxu1 %v2855_v50 }
 0xfb5   : > { %3498 = vmatprep.subr.mxu1 %v2870_v51 }
 0xfb6   : > { %3499 = vmatpush3.msra.mxu1 %v2854_v52 }
0x1026   : > { %v2709_v8 = vpop.xlane.xlu0 %2708 }
0x1027   : > { %v2710_v56 = vmul.f32 0.015625, %v2709_v8  ;;  %v2753_v8 = vshrl.u32 %v2752_v55, 7 }
0x1029   : > { %v2711_v57 = vsub.f32 %v4453_v54, %v2710_v56  ;;  %v2754_v56 = vsub.s32 0, %v2753_v8 }
0x102b   : > { %v2712_v58 = vmul.f32 %v2711_v57, %v2711_v57 }
0x102d   : > { %v2713_v59 = vsel %vm656_vm1, %v2712_v58, 0.0  ;;  %v2758_v58 = vsub.s32 1, %v2753_v8 }
0x102e   : > { %2714 = vadd.xlane.f32.xlu1 %v2713_v59 }
0x10b7   : > { %v2715_v13 = vpop.xlane.xlu1 %2714 }
0x10b8   : > { %v2716_v14 = vmul.f32 0.015625, %v2715_v13 }
0x10ba   : > { %v2717_v15 = vadd.f32 1e-06, %v2716_v14 }
0x10bc   : > { %3861 = vrsqrt.f32 %v2717_v15 }
0x10c9   : > { %v3862_v16 = vpop.eup %3861 }
0x10ca   : > { %v2719_v18 = vmul.f32 %v3862_v16, %v2711_v57  ;;  %v2750_v57 = vld [vmem:[%s4067_s23] sm:$0x3] }
0x10cb   : > { %v2755_v59 = vrot.slane %v2750_v57, %v2754_v56  ;;  %v2759_v60 = vrot.slane %v2750_v57, %v2758_v58 }
0x10cc   : > { %v2726_v20 = vmul.f32 %v3323_v17, %v2719_v18 }
0x10ce   : > { %v2733_v21 = vadd.f32 %v3324_v19, %v2726_v20 }
0x10d0   : > { %3325 = vmatmul.mubr.msk.f32.vlgmr.msra.gmra.mxu0 %vm700_vm3, %v2733_v21  ;;  %v3326_v21 = vld [vmem:[%s641_s2] ss:$0 sm:$0xff] }
0x1190   : > { %v2831_v61 = vpop.f32.mrf.mxu0 }
0x1191   : > { %v2832_v62 = vadd.f32 %v2831_v61, %v2755_v59 }
0x1192   : > { %v2833_v63 = vpop.f32.mrf.mxu0 }
0x1193   : > { %v2838_v0 = vmul.f32 0.044715, %v2832_v62  ;;  %v2834_v1 = vadd.f32 %v2833_v63, %v2759_v60  ;;  %v2836_v17 = vmul.f32 0.5, %v2832_v62 }
0x1195   : > { %v2840_v2 = vmul.f32 %v2838_v0, %v2832_v62  ;;  %v2839_v3 = vmul.f32 0.044715, %v2834_v1  ;;  %v2837_v15 = vmul.f32 0.5, %v2834_v1 }
0x1197   : > { %v2842_v4 = vmul.f32 %v2840_v2, %v2832_v62  ;;  %v2841_v5 = vmul.f32 %v2839_v3, %v2834_v1 }
0x1199   : > { %v2844_v6 = vadd.f32 %v2842_v4, %v2832_v62  ;;  %v2843_v7 = vmul.f32 %v2841_v5, %v2834_v1 }
0x119b   : > { %v2845_v9 = vadd.f32 %v2843_v7, %v2834_v1  ;;  %v2846_v10 = vmul.f32 0.7978846, %v2844_v6 }
0x119d   : > { %v2847_v11 = vmul.f32 0.7978846, %v2845_v9  ;;  %3863 = vtanh.f32 %v2846_v10 }
0x119f   : > { %3865 = vtanh.f32 %v2847_v11 }
0x11aa   : > { %v3864_v12 = vpop.eup %3863 }
0x11ab   : > { %v2850_v14 = vadd.f32 1.0, %v3864_v12 }
0x11ac   : > { %v3866_v13 = vpop.eup %3865 }
0x11ad   : > { %v2851_v16 = vadd.f32 1.0, %v3866_v13  ;;  %v2852_v19 = vmul.f32 %v2850_v14, %v2836_v17 }
0x11af   : > { %v2853_v18 = vmul.f32 %v2851_v16, %v2837_v15 }
0x11b1   : > { %2957 = vmatprep.mubr.f32.mxu1 %v2853_v18 }
0x11b2   : > { %2958 = vmatmul.mubr.f32.vlgmr.msra.gmra.mxu1 %v2852_v19 }
0x1272   : > { %v3500_v20 = vpop.f32.mrf.mxu1 }
0x1274   : > { %v3501_v22 = vpop.f32.mrf.mxu1 }
0x1275   : > { %v3502_v23 = vadd.f32 %v3501_v22, %v3500_v20 }
0x1277   : > { %v2960_v24 = vadd.f32 %v3502_v23, %v3326_v21 }
0x1279   : > { %v2963_v25 = vadd.f32 %v2960_v24, %v4453_v54 }
0x127b   : > { %2964 = vst.msk [vmem:[%s4082_s5] sm:$0x1f] %vm656_vm1, %v2963_v25 }
0x127c PF: > { %s4586_s17 = sld [smem:[#allocation5_spill]] }
0x127d   : > { %s4587_s25 = sld [smem:[#allocation3_spill]] }
0x127e   : > { %s4588_s26 = sld [smem:[#allocation4_spill]] }
0x127f   : > { %s4589_s27 = sld [smem:[#allocation6_spill]] }
0x1280   : > { %s4590_s28 = sld [smem:[#allocation7_spill]] }
0x1282   : > { %s23_s29 = sadd.s32 1, %s4586_s17  }
0x1283   : > { %p20_p8 = scmp.ge.s32.totalorder %s23_s29, 6  }
0x1285   :  { %22 = sbr.rel (!%p20_p8) target bundleno = 7 (0x7), region = 167 }

</bundles_post_ra>
